<compile_context>
chip_gen: v7x
topology: tpu7x:2x2x1
jax: 0.10.0
libtpu: 0.0.40
codegen_flags: <defaults>
</compile_context>

<pallas_src>
import jax
import jax.numpy as jnp
from jax import lax
from jax.experimental import pallas as pl
from jax.experimental.pallas import tpu as pltpu

EPS = 1e-5


def bottleneck_kernel(x_ref, w1_ref, w2_ref, w3_ref, b1_ref, b2_ref, b3_ref,
                      o_ref):
    # x_ref block: (NB, H, W, Cin) channels-last, f32; o_ref block: same.
    # w1_ref: (Cin, Cmid) bf16 (bn1 scale folded)
    # w2_ref: (3*Cmid, 3*Cmid) bf16, rows = (kx, ci), cols = (ky, co), bn2 folded
    # w3_ref: (Cmid, Cin) bf16 (bn3 scale folded)
    # b*_ref: folded BN biases, f32, shapes (1, Cmid)/(1, Cmid)/(1, Cin)
    NB, H, W, Cin = x_ref.shape
    Cmid = w1_ref.shape[1]
    M = NB * H * W

    # --- conv1 (1x1) + bias + relu: bf16 MXU operands, f32 accumulation ---
    xb = x_ref[...].astype(jnp.bfloat16).reshape(M, Cin)   # leading-dim merge
    h1 = jnp.dot(xb, w1_ref[...], preferred_element_type=jnp.float32)
    h1 = jnp.maximum(h1 + b1_ref[...], 0.0)                # (M, Cmid) f32

    # --- conv2 (3x3, stride 1, pad 1) -- scratch-free, single wide matmul ---
    # im2col over kx (input K = 3*Cmid) with the 3 ky taps stacked on the
    # output dim (N = 3*Cmid); ky row-shifts are applied to the result blocks.
    h1v = h1.reshape(NB, H, W, Cmid)                        # leading-dim split

    def shift_w(a, d):
        # t[..., x, :] = a[..., x + d, :], zero-filled outside [0, W)
        zc = jnp.zeros((NB, H, 1, Cmid), a.dtype)
        if d < 0:   # kx = 0 tap: input column x-1
            return jnp.concatenate([zc, a[:, :, :W - 1, :]], axis=2)
        else:       # kx = 2 tap: input column x+1
            return jnp.concatenate([a[:, :, 1:, :], zc], axis=2)

    im2col = jnp.concatenate([shift_w(h1v, -1), h1v, shift_w(h1v, 1)],
                             axis=3).astype(jnp.bfloat16)   # (NB,H,W,3*Cmid)
    parts = jnp.dot(im2col.reshape(M, 3 * Cmid), w2_ref[...],
                    preferred_element_type=jnp.float32)     # (M, 3*Cmid) f32
    parts = parts.reshape(NB, H, W, 3 * Cmid)
    p_top = parts[..., 0:Cmid]            # ky = 0: needs input row y-1
    p_mid = parts[..., Cmid:2 * Cmid]     # ky = 1: aligned
    p_bot = parts[..., 2 * Cmid:]         # ky = 2: needs input row y+1
    zr = jnp.zeros((NB, 1, W, Cmid), jnp.float32)
    conv2 = (p_mid
             + jnp.concatenate([zr, p_top[:, :H - 1]], axis=1)
             + jnp.concatenate([p_bot[:, 1:], zr], axis=1))
    h2 = jnp.maximum(conv2.reshape(M, Cmid) + b2_ref[...], 0.0)   # (M, Cmid)

    # --- conv3 (1x1) + bias ---
    h3 = jnp.dot(h2.astype(jnp.bfloat16), w3_ref[...],
                 preferred_element_type=jnp.float32) + b3_ref[...]  # (M, Cin)

    # --- weighted shortcut + relu; x re-read from VMEM block (f32) ---
    x_res = x_ref[...].reshape(M, Cin)
    out = jnp.maximum(h3 + 0.2 * x_res, 0.0)
    o_ref[...] = out.reshape(NB, H, W, Cin)   # Cin % 128 == 0 -> lane-dense vst


def _vmem_bytes_estimate(nb, H, W, Cin, Cmid):
    """Rough upper bound: double-buffered I/O blocks + weights + live values."""
    f32, bf16 = 4, 2
    m = nb * H * W
    io = 2 * 2 * m * Cin * f32                                  # in + out, x2 buf
    weights = 2 * ((Cin * Cmid + 9 * Cmid * Cmid + Cmid * Cin) * bf16
                   + (2 * Cmid + Cin) * f32)
    temps = m * (Cin * (f32 + bf16)              # x value + bf16 cast
                 + Cmid * f32 * 4                # h1 + shifted taps
                 + 3 * Cmid * (2 * f32 + bf16)   # im2col + parts
                 + Cmid * f32 * 5                # ky slices + combine + h2
                 + Cmid * bf16
                 + Cin * f32 * 2)                # h3 + out
    return io + weights + temps


def bottleneck_forward(x_nhwc, params, batch_block=1):
    """x_nhwc: (N, H, W, Cin) float32, Cin ideally a multiple of 128 (NHWC)."""
    N, H, W, Cin = x_nhwc.shape
    Cmid = params["w1"].shape[1]
    nb = batch_block
    assert N % nb == 0
    num_steps = N // nb
    # >= 2 steps keeps BlockSpec double-buffering + v7x megacore useful; an
    # even step count keeps both v7x TensorCores busy. (2 steps at test shape.)
    assert num_steps >= 2, "pick batch_block so the grid has >= 2 steps"

    # Sized for the tightest chip (v7x: 64 MiB physical / 32 MiB scoped VMEM).
    vmem_limit = 32 * 1024 * 1024
    assert _vmem_bytes_estimate(nb, H, W, Cin, Cmid) < vmem_limit, \
        "shrink batch_block (or tile H) to fit the VMEM budget"

    return pl.pallas_call(
        bottleneck_kernel,
        out_shape=jax.ShapeDtypeStruct((N, H, W, Cin), jnp.float32),
        grid_spec=pltpu.PrefetchScalarGridSpec(
            num_scalar_prefetch=0,
            grid=(num_steps,),
            in_specs=[
                pl.BlockSpec((nb, H, W, Cin), lambda n: (n, 0, 0, 0)),
                pl.BlockSpec((Cin, Cmid), lambda n: (0, 0)),
                pl.BlockSpec((3 * Cmid, 3 * Cmid), lambda n: (0, 0)),
                pl.BlockSpec((Cmid, Cin), lambda n: (0, 0)),
                pl.BlockSpec((1, Cmid), lambda n: (0, 0)),
                pl.BlockSpec((1, Cmid), lambda n: (0, 0)),
                pl.BlockSpec((1, Cin), lambda n: (0, 0)),
            ],
            out_specs=pl.BlockSpec((nb, H, W, Cin), lambda n: (n, 0, 0, 0)),
        ),
        compiler_params=pltpu.CompilerParams(
            dimension_semantics=("parallel",),
            vmem_limit_bytes=vmem_limit),
    )(x_nhwc.astype(jnp.float32), params["w1"], params["w2"], params["w3"],
      params["b1"], params["b2"], params["b3"])


def make_params(key, in_features):
    """Deterministic init. PyTorch OIHW layouts kept for the reference path;
    BN scales folded into the (bf16) kernel weights for the Pallas path."""
    Cin, Cmid = in_features, in_features // 4
    ks = jax.random.split(key, 6)
    w1 = jax.random.normal(ks[0], (Cmid, Cin, 1, 1), jnp.float32) * 0.1   # OIHW
    w2 = jax.random.normal(ks[1], (Cmid, Cmid, 3, 3), jnp.float32) * 0.1
    w3 = jax.random.normal(ks[2], (Cin, Cmid, 1, 1), jnp.float32) * 0.1

    def bn_init(k, c):
        k1, k2, k3, k4 = jax.random.split(k, 4)
        gamma = jax.random.uniform(k1, (c,), jnp.float32, 0.5, 1.5)
        beta = jax.random.normal(k2, (c,), jnp.float32) * 0.1
        mean = jax.random.normal(k3, (c,), jnp.float32) * 0.1
        var = jax.random.uniform(k4, (c,), jnp.float32, 0.5, 1.5)
        return gamma, beta, mean, var

    bn1, bn2, bn3 = bn_init(ks[3], Cmid), bn_init(ks[4], Cmid), bn_init(ks[5], Cin)

    def fold(bn):
        g, b, m, v = bn
        s = g / jnp.sqrt(v + EPS)
        return s, b - m * s

    s1, c1 = fold(bn1)
    s2, c2 = fold(bn2)
    s3, c3 = fold(bn3)

    # conv2 weights: OIHW -> (ky,kx,ci,co), fold bn2 scale, then stack as
    # rows = (kx, ci)  [matches the im2col channel order in the kernel]
    # cols = (ky, co)  [the 3 ky taps live on the matmul output dim]
    w2_hwio = jnp.transpose(w2, (2, 3, 1, 0)) * s2[None, None, None, :]
    w2_stack = jnp.transpose(w2_hwio, (1, 2, 0, 3)).reshape(3 * Cmid, 3 * Cmid)

    kernel_params = {
        "w1": (w1[:, :, 0, 0].T * s1[None, :]).astype(jnp.bfloat16),  # (Cin, Cmid)
        "w2": w2_stack.astype(jnp.bfloat16),                          # (3Cmid, 3Cmid)
        "w3": (w3[:, :, 0, 0].T * s3[None, :]).astype(jnp.bfloat16),  # (Cmid, Cin)
        "b1": c1.reshape(1, Cmid),
        "b2": c2.reshape(1, Cmid),
        "b3": c3.reshape(1, Cin),
    }
    ref_params = {
        "w1": jnp.transpose(w1, (2, 3, 1, 0)),   # HWIO
        "w2": jnp.transpose(w2, (2, 3, 1, 0)),
        "w3": jnp.transpose(w3, (2, 3, 1, 0)),
        "bn1": bn1, "bn2": bn2, "bn3": bn3,
    }
    return kernel_params, ref_params


def reference_forward(x_nhwc, p):
    """Pure-JAX NHWC reference mirroring the PyTorch forward (eval-mode BN)."""
    def conv(x, w, pad):
        return lax.conv_general_dilated(
            x, w, (1, 1), pad,
            dimension_numbers=("NHWC", "HWIO", "NHWC"),
            precision=lax.Precision.HIGHEST)

    def bn(x, stats):
        g, b, m, v = stats
        sh = (1, 1, 1, -1)
        return (x - m.reshape(sh)) / jnp.sqrt(v.reshape(sh) + EPS) \
            * g.reshape(sh) + b.reshape(sh)

    out = jax.nn.relu(bn(conv(x_nhwc, p["w1"], "VALID"), p["bn1"]))
    out = jax.nn.relu(bn(conv(out, p["w2"], [(1, 1), (1, 1)]), p["bn2"]))
    out = bn(conv(out, p["w3"], "VALID"), p["bn3"])
    return jax.nn.relu(out + 0.2 * x_nhwc)


if __name__ == "__main__":
    key = jax.random.PRNGKey(0)
    kx, kp = jax.random.split(key)

    # in_features = 128 (lane-dense Cin), Cmid = 32; NHWC layout.
    N, H, W, Cin = 2, 16, 16, 128
    x = jax.random.normal(kx, (N, H, W, Cin), jnp.float32)

    kernel_params, ref_params = make_params(kp, Cin)

    out = jax.block_until_ready(
        bottleneck_forward(x, kernel_params, batch_block=1))   # grid = (2,)
    ref = jax.block_until_ready(reference_forward(x, ref_params))

    assert out.shape == (N, H, W, Cin)
    max_err = float(jnp.max(jnp.abs(out - ref)))
    # bf16 MXU operands (f32 accumulation) vs an f32 HIGHEST-precision
    # reference -> wider tolerance than the previous all-f32 kernel.
    assert jnp.allclose(out, ref, rtol=5e-2, atol=1e-1), \
        f"max abs err {max_err}"

    print("KERNEL_OK")
</pallas_src>

<mosaic_0001>
module attributes {stable_mosaic.version = 11 : i64} {
  func.func @bottleneck_kernel(%arg0: i32, %arg1: memref<1x16x16x128xf32, #tpu.memory_space<vmem>>, %arg2: memref<128x32xbf16, #tpu.memory_space<vmem>>, %arg3: memref<96x96xbf16, #tpu.memory_space<vmem>>, %arg4: memref<32x128xbf16, #tpu.memory_space<vmem>>, %arg5: memref<1x32xf32, #tpu.memory_space<vmem>>, %arg6: memref<1x32xf32, #tpu.memory_space<vmem>>, %arg7: memref<1x128xf32, #tpu.memory_space<vmem>>, %arg8: memref<1x16x16x128xf32, #tpu.memory_space<vmem>>) attributes {dimension_semantics = [#tpu.dimension_semantics<parallel>], iteration_bounds = array<i64: 2>, scalar_prefetch = 0 : i64, scratch_operands = 0 : i64, tpu.core_type = #tpu.core_type<tc>, window_params = [{transform_indices = @transform_0, window_bounds = array<i64: 1, 16, 16, 128>}, {pipeline_mode = #tpu.pipeline_mode<synchronous>, transform_indices = @transform_1, window_bounds = array<i64: 128, 32>}, {pipeline_mode = #tpu.pipeline_mode<synchronous>, transform_indices = @transform_2, window_bounds = array<i64: 96, 96>}, {pipeline_mode = #tpu.pipeline_mode<synchronous>, transform_indices = @transform_3, window_bounds = array<i64: 32, 128>}, {pipeline_mode = #tpu.pipeline_mode<synchronous>, transform_indices = @transform_4, window_bounds = array<i64: 1, 32>}, {pipeline_mode = #tpu.pipeline_mode<synchronous>, transform_indices = @transform_5, window_bounds = array<i64: 1, 32>}, {pipeline_mode = #tpu.pipeline_mode<synchronous>, transform_indices = @transform_6, window_bounds = array<i64: 1, 128>}, {transform_indices = @transform_7, window_bounds = array<i64: 1, 16, 16, 128>}]} {
    %c0 = arith.constant 0 : index
    %c0_0 = arith.constant 0 : index
    %c0_1 = arith.constant 0 : index
    %c0_2 = arith.constant 0 : index
    %0 = vector.load %arg1[%c0, %c0_0, %c0_1, %c0_2] : memref<1x16x16x128xf32, #tpu.memory_space<vmem>>, vector<1x16x16x128xf32>
    %1 = arith.truncf %0 : vector<1x16x16x128xf32> to vector<1x16x16x128xbf16>
    %2 = vector.shape_cast %1 : vector<1x16x16x128xbf16> to vector<256x128xbf16>
    %c0_3 = arith.constant 0 : index
    %c0_4 = arith.constant 0 : index
    %3 = vector.load %arg2[%c0_3, %c0_4] : memref<128x32xbf16, #tpu.memory_space<vmem>>, vector<128x32xbf16>
    %cst = arith.constant dense<0.000000e+00> : vector<256x32xf32>
    %4 = tpu.matmul %2, %3, %cst {dimension_numbers = #tpu.dot_dimension_numbers<[1], [0], [0], [1], [0, 0, 1, 1], [], []>} : vector<256x128xbf16>, vector<128x32xbf16>, vector<256x32xf32> -> vector<256x32xf32>
    %c0_5 = arith.constant 0 : index
    %c0_6 = arith.constant 0 : index
    %5 = vector.load %arg5[%c0_5, %c0_6] : memref<1x32xf32, #tpu.memory_space<vmem>>, vector<1x32xf32>
    %6 = vector.broadcast %5 : vector<1x32xf32> to vector<256x32xf32>
    %7 = arith.addf %4, %6 : vector<256x32xf32>
    %cst_7 = arith.constant 0.000000e+00 : f32
    %8 = vector.broadcast %cst_7 : f32 to vector<256x32xf32>
    %9 = arith.maximumf %7, %8 : vector<256x32xf32>
    %10 = vector.shape_cast %9 : vector<256x32xf32> to vector<1x16x16x32xf32>
    %cst_8 = arith.constant 0.000000e+00 : f32
    %11 = vector.broadcast %cst_8 : f32 to vector<1x16x1x32xf32>
    %12 = vector.extract_strided_slice %10 {offsets = [0, 0, 0, 0], sizes = [1, 16, 15, 32], strides = [1, 1, 1, 1]} : vector<1x16x16x32xf32> to vector<1x16x15x32xf32>
    %13 = tpu.concatenate %11, %12 in 2 : vector<1x16x1x32xf32>, vector<1x16x15x32xf32> -> vector<1x16x16x32xf32>
    %cst_9 = arith.constant 0.000000e+00 : f32
    %14 = vector.broadcast %cst_9 : f32 to vector<1x16x1x32xf32>
    %15 = vector.extract_strided_slice %10 {offsets = [0, 0, 1, 0], sizes = [1, 16, 15, 32], strides = [1, 1, 1, 1]} : vector<1x16x16x32xf32> to vector<1x16x15x32xf32>
    %16 = tpu.concatenate %15, %14 in 2 : vector<1x16x15x32xf32>, vector<1x16x1x32xf32> -> vector<1x16x16x32xf32>
    %17 = tpu.concatenate %13, %10, %16 in 3 : vector<1x16x16x32xf32>, vector<1x16x16x32xf32>, vector<1x16x16x32xf32> -> vector<1x16x16x96xf32>
    %18 = arith.truncf %17 : vector<1x16x16x96xf32> to vector<1x16x16x96xbf16>
    %19 = vector.shape_cast %18 : vector<1x16x16x96xbf16> to vector<256x96xbf16>
    %c0_10 = arith.constant 0 : index
    %c0_11 = arith.constant 0 : index
    %20 = vector.load %arg3[%c0_10, %c0_11] : memref<96x96xbf16, #tpu.memory_space<vmem>>, vector<96x96xbf16>
    %cst_12 = arith.constant dense<0.000000e+00> : vector<256x96xf32>
    %21 = tpu.matmul %19, %20, %cst_12 {dimension_numbers = #tpu.dot_dimension_numbers<[1], [0], [0], [1], [0, 0, 1, 1], [], []>} : vector<256x96xbf16>, vector<96x96xbf16>, vector<256x96xf32> -> vector<256x96xf32>
    %22 = vector.shape_cast %21 : vector<256x96xf32> to vector<1x16x16x96xf32>
    %23 = vector.extract_strided_slice %22 {offsets = [0, 0, 0, 0], sizes = [1, 16, 16, 32], strides = [1, 1, 1, 1]} : vector<1x16x16x96xf32> to vector<1x16x16x32xf32>
    %24 = vector.extract_strided_slice %22 {offsets = [0, 0, 0, 32], sizes = [1, 16, 16, 32], strides = [1, 1, 1, 1]} : vector<1x16x16x96xf32> to vector<1x16x16x32xf32>
    %25 = vector.extract_strided_slice %22 {offsets = [0, 0, 0, 64], sizes = [1, 16, 16, 32], strides = [1, 1, 1, 1]} : vector<1x16x16x96xf32> to vector<1x16x16x32xf32>
    %cst_13 = arith.constant 0.000000e+00 : f32
    %26 = vector.broadcast %cst_13 : f32 to vector<1x1x16x32xf32>
    %27 = vector.extract_strided_slice %23 {offsets = [0, 0, 0, 0], sizes = [1, 15, 16, 32], strides = [1, 1, 1, 1]} : vector<1x16x16x32xf32> to vector<1x15x16x32xf32>
    %28 = tpu.concatenate %26, %27 in 1 : vector<1x1x16x32xf32>, vector<1x15x16x32xf32> -> vector<1x16x16x32xf32>
    %29 = arith.addf %24, %28 : vector<1x16x16x32xf32>
    %30 = vector.extract_strided_slice %25 {offsets = [0, 1, 0, 0], sizes = [1, 15, 16, 32], strides = [1, 1, 1, 1]} : vector<1x16x16x32xf32> to vector<1x15x16x32xf32>
    %31 = tpu.concatenate %30, %26 in 1 : vector<1x15x16x32xf32>, vector<1x1x16x32xf32> -> vector<1x16x16x32xf32>
    %32 = arith.addf %29, %31 : vector<1x16x16x32xf32>
    %33 = vector.shape_cast %32 : vector<1x16x16x32xf32> to vector<256x32xf32>
    %c0_14 = arith.constant 0 : index
    %c0_15 = arith.constant 0 : index
    %34 = vector.load %arg6[%c0_14, %c0_15] : memref<1x32xf32, #tpu.memory_space<vmem>>, vector<1x32xf32>
    %35 = vector.broadcast %34 : vector<1x32xf32> to vector<256x32xf32>
    %36 = arith.addf %33, %35 : vector<256x32xf32>
    %cst_16 = arith.constant 0.000000e+00 : f32
    %37 = vector.broadcast %cst_16 : f32 to vector<256x32xf32>
    %38 = arith.maximumf %36, %37 : vector<256x32xf32>
    %39 = arith.truncf %38 : vector<256x32xf32> to vector<256x32xbf16>
    %c0_17 = arith.constant 0 : index
    %c0_18 = arith.constant 0 : index
    %40 = vector.load %arg4[%c0_17, %c0_18] : memref<32x128xbf16, #tpu.memory_space<vmem>>, vector<32x128xbf16>
    %cst_19 = arith.constant dense<0.000000e+00> : vector<256x128xf32>
    %41 = tpu.matmul %39, %40, %cst_19 {dimension_numbers = #tpu.dot_dimension_numbers<[1], [0], [0], [1], [0, 0, 1, 1], [], []>} : vector<256x32xbf16>, vector<32x128xbf16>, vector<256x128xf32> -> vector<256x128xf32>
    %c0_20 = arith.constant 0 : index
    %c0_21 = arith.constant 0 : index
    %42 = vector.load %arg7[%c0_20, %c0_21] : memref<1x128xf32, #tpu.memory_space<vmem>>, vector<1x128xf32>
    %43 = vector.broadcast %42 : vector<1x128xf32> to vector<256x128xf32>
    %44 = arith.addf %41, %43 : vector<256x128xf32>
    %c0_22 = arith.constant 0 : index
    %c0_23 = arith.constant 0 : index
    %c0_24 = arith.constant 0 : index
    %c0_25 = arith.constant 0 : index
    %45 = vector.load %arg1[%c0_22, %c0_23, %c0_24, %c0_25] : memref<1x16x16x128xf32, #tpu.memory_space<vmem>>, vector<1x16x16x128xf32>
    %46 = vector.shape_cast %45 : vector<1x16x16x128xf32> to vector<256x128xf32>
    %cst_26 = arith.constant 2.000000e-01 : f32
    %47 = vector.broadcast %cst_26 : f32 to vector<256x128xf32>
    %48 = arith.mulf %47, %46 : vector<256x128xf32>
    %49 = arith.addf %44, %48 : vector<256x128xf32>
    %cst_27 = arith.constant 0.000000e+00 : f32
    %50 = vector.broadcast %cst_27 : f32 to vector<256x128xf32>
    %51 = arith.maximumf %49, %50 : vector<256x128xf32>
    %52 = vector.shape_cast %51 : vector<256x128xf32> to vector<1x16x16x128xf32>
    %c0_28 = arith.constant 0 : index
    %c0_29 = arith.constant 0 : index
    %c0_30 = arith.constant 0 : index
    %c0_31 = arith.constant 0 : index
    %53 = vector.load %arg8[%c0_28, %c0_29, %c0_30, %c0_31] : memref<1x16x16x128xf32, #tpu.memory_space<vmem>>, vector<1x16x16x128xf32>
    tpu.vector_store %arg8[%c0_28, %c0_29, %c0_30, %c0_31], %52 {strides = array<i32>} : memref<1x16x16x128xf32, #tpu.memory_space<vmem>>, vector<1x16x16x128xf32>,
    return
  }
  func.func @transform_0(%arg0: i32) -> (i32, i32, i32, i32) {
    %c0_i32 = arith.constant 0 : i32
    %c0_i32_0 = arith.constant 0 : i32
    %c0_i32_1 = arith.constant 0 : i32
    %c0_i32_2 = arith.constant 0 : i32
    return %arg0, %c0_i32, %c0_i32_0, %c0_i32_1 : i32, i32, i32, i32
  }
  func.func @transform_1(%arg0: i32) -> (i32, i32) {
    %c0_i32 = arith.constant 0 : i32
    %c0_i32_0 = arith.constant 0 : i32
    %c0_i32_1 = arith.constant 0 : i32
    return %c0_i32, %c0_i32_0 : i32, i32
  }
  func.func @transform_2(%arg0: i32) -> (i32, i32) {
    %c0_i32 = arith.constant 0 : i32
    %c0_i32_0 = arith.constant 0 : i32
    %c0_i32_1 = arith.constant 0 : i32
    return %c0_i32, %c0_i32_0 : i32, i32
  }
  func.func @transform_3(%arg0: i32) -> (i32, i32) {
    %c0_i32 = arith.constant 0 : i32
    %c0_i32_0 = arith.constant 0 : i32
    %c0_i32_1 = arith.constant 0 : i32
    return %c0_i32, %c0_i32_0 : i32, i32
  }
  func.func @transform_4(%arg0: i32) -> (i32, i32) {
    %c0_i32 = arith.constant 0 : i32
    %c0_i32_0 = arith.constant 0 : i32
    %c0_i32_1 = arith.constant 0 : i32
    return %c0_i32, %c0_i32_0 : i32, i32
  }
  func.func @transform_5(%arg0: i32) -> (i32, i32) {
    %c0_i32 = arith.constant 0 : i32
    %c0_i32_0 = arith.constant 0 : i32
    %c0_i32_1 = arith.constant 0 : i32
    return %c0_i32, %c0_i32_0 : i32, i32
  }
  func.func @transform_6(%arg0: i32) -> (i32, i32) {
    %c0_i32 = arith.constant 0 : i32
    %c0_i32_0 = arith.constant 0 : i32
    %c0_i32_1 = arith.constant 0 : i32
    return %c0_i32, %c0_i32_0 : i32, i32
  }
  func.func @transform_7(%arg0: i32) -> (i32, i32, i32, i32) {
    %c0_i32 = arith.constant 0 : i32
    %c0_i32_0 = arith.constant 0 : i32
    %c0_i32_1 = arith.constant 0 : i32
    %c0_i32_2 = arith.constant 0 : i32
    return %arg0, %c0_i32, %c0_i32_0, %c0_i32_1 : i32, i32, i32, i32
  }
}

</mosaic_0001>

<bundles_post_ra>
// kernel: tpu_custom_call.1
= control target key start
LH: loop header
LB: loop body
LE: loop exit
PB: predicated region body
PF: predicated region fallthrough
CT: control target
= control target key end

     0   :  { %12 = vsyncpa [#allocation3], 0  ;;  %s3963_s0 = inlined_call_operand.hbm [shape: f32[2,16,16,128], index: 0, kind: input, shape index: {}]   ;;  %s3964_s1 = inlined_call_operand.vmem [shape: bf16[128,32], index: 1, kind: input, shape index: {}]   ;;  %s3965_s2 = inlined_call_operand.vmem [shape: bf16[96,96], index: 2, kind: input, shape index: {}]   ;;  %s3966_s3 = inlined_call_operand.vmem [shape: bf16[32,128], index: 3, kind: input, shape index: {}]   ;;  %s3967_s4 = inlined_call_operand.vmem [shape: f32[1,32], index: 4, kind: input, shape index: {}]   ;;  %s3968_s5 = inlined_call_operand.vmem [shape: f32[1,32], index: 5, kind: input, shape index: {}]   ;;  %s3969_s6 = inlined_call_operand.vmem [shape: f32[1,128], index: 6, kind: input, shape index: {}]   ;;  %s3970_s7 = inlined_call_operand.hbm [shape: f32[2,16,16,128], index: 7, kind: output, shape index: {}]  }
   0x1   :  { %14 = vsyncpa [#allocation3 + $0x1], 0 }
   0x2   :  { %15 = vsyncpa [#allocation4], 0 }
   0x3   :  { %17 = vsyncpa [#allocation4 + $0x1], 0  ;;  %s2916_s24 = smov 0   ;;  %s2918_s25 = smov 0  }
   0x4   :  { %s2920_s26 = smov 0   ;;  %s2922_s27 = smov 0  }
   0x5 LB: > { %s2937_s28 = sadd.s32 4294967295, %s2864_s27   ;;  %s2235_s29 = sadd.s32 4294967294, %s2864_s27   ;;  %s2864_s27 = sphi %s2922_s27, %s3985_s27   ;;  %s2860_s26 = sphi %s2920_s26, %s3984_s26   ;;  %s2856_s25 = sphi %s2918_s25, %s3983_s25   ;;  %s2852_s24 = sphi %s2916_s24, %s3982_s24  }
   0x6   : > { %s2941_s30 = sadd.s32 1, %s2864_s27   ;;  %s30_s8 = sadd.s32 1, %s2860_s26 }
   0x7   : > { %s27_s9 = ssub.s32 %s2864_s27, %s2941_s30  ;;  %p37_p0 = scmp.ne.s32.totalorder %s2860_s26, %s2856_s25 }
   0x8   : > { %p28_p1 = scmp.eq.s32.totalorder %s27_s9, 0  ;;  %p38_p2 = scmp.eq.s32.totalorder %s2864_s27, 0 }
   0x9   : > { %p43_p3 = scmp.ne.s32.totalorder %s2856_s25, %s2852_s24  ;;  %p44_p4 = scmp.eq.s32.totalorder %s2937_s28, 0 }
   0xa   : > { %s2953_s10 = scalar_select %p28_p1, %s2860_s26, %s30_s8  }
   0xb   : > { %p2955_p5 = por %p38_p2, %p37_p0  ;;  %p2959_p6 = por %p44_p4, %p43_p3 }
   0xc   : > { %p193_p7 = scmp.eq.s32.totalorder %s2937_s28, 1  ;;  %p199_p8 = scmp.eq.s32.totalorder %s2235_s29, 1 }
   0xd   : > { %p2518_p10 = scmp.lt.s32.totalorder %s2864_s27, 2  ;;  %s237_s15 = sand.u32 1, %s2860_s26  }
   0xe   : > { %p2966_p11 = por %p193_p7, %p37_p0  ;;  %p2970_p12 = por %p199_p8, %p43_p3 }
   0xf   : > { %s2300_s16 = sshll.u32 %s2864_s27, 12  ;;  %s2238_s17 = sshll.u32 %s237_s15, 8 }
  0x10   : > { %s3975_s13 = scalar_select %p2966_p11, 1, 0 }
  0x11   : > { %s3976_s14 = scalar_select %p2970_p12, 1, 0 }
  0x12   : > { %s2979_s20 = scalar_lea.hbm %s3963_s0, %s2300_s16  ;;  %s241_s21 = scalar_lea.vmem [#allocation2], %s2238_s17 }
  0x13   : > { %s248_s22 = sshll.u32 %s241_s21, 4  ;;  %p2983_p13 = pnand %p2518_p10, %p2955_p5  ;;  %s2987_s22 = int_to_ptr.vmem [resolvable:$true] %s248_s22 }
  0x14   : > { %s2989_s29 = scalar_lea.sflag [#allocation3], %s237_s15  ;;  %s2768_s8 = scalar_lea.hbm %s2979_s20, 4096 }
  0x15   : > { %p2769_p0 = scmp.ne.s32.totalorder %s2979_s20, %s2768_s8  ;;  %p2770_p1 = pneg %p2983_p13 }
  0x16   : > { %s2773_s16 = scalar_lea.hbm %s3963_s0, 8192  ;;  %p2774_p4 = scmp.lt.u32.totalorder %s2979_s20, %s3963_s0 }
  0x17   : > { %p2771_p2 = pnand %p2770_p1, %p2769_p0  ;;  %p2775_p5 = scmp.lt.u32.totalorder %s2773_s16, %s2768_s8 }
  0x18   : > { %p2777_p8 = scmp.lt.u32.totalorder %s2768_s8, %s2979_s20 }
  0x19   : > { %p2772_p3 = pneg %p2771_p2  ;;  %p2776_p7 = por %p2775_p5, %p2774_p4 }
  0x1b   : > { %p2778_p10 = por %p2777_p8, %p2776_p7 }
  0x1d   : > { %p2779_p9 = pnand %p2778_p10, %p2772_p3 }
  0x1f   : > { %2782 = shalt.err (!%p2779_p9)
}
  0x20   : > { %s2783_s15 = scalar_lea.vmem %s2987_s22, 4096  ;;  %s2866_s19 = smov [#allocation2]  }
  0x21   : > { %p2784_p0 = scmp.ne.s32.totalorder %s2987_s22, %s2783_s15  ;;  %s2788_s21 = sshll.u32 %s2866_s19, 4  ;;  %s2789_s21 = int_to_ptr.vmem [resolvable:$false] %s2788_s21 }
  0x22   : > { %s2790_s9 = scalar_lea.vmem %s2789_s21, 8192  ;;  %p2791_p11 = scmp.lt.s32.totalorder %s2987_s22, %s2789_s21 }
  0x23   : > { %p2786_p2 = pnand %p2784_p0, %p2770_p1  ;;  %p2792_p4 = scmp.lt.s32.totalorder %s2790_s9, %s2783_s15 }
  0x25   : > { %p2787_p12 = pneg %p2786_p2  ;;  %p2793_p5 = por %p2792_p4, %p2791_p11 }
  0x27   : > { %p2794_p7 = pnand %p2793_p5, %p2787_p12 }
  0x29   : > { %2797 = shalt.err (!%p2794_p7)
}
  0x2a   : > { %s2867_s8 = smov 128   ;;  %s2868_s11 = smov 8  }
  0x2b   : > { %2513 = dma.hbm_to_vmem [thread:$0]  (!%p2983_p13), %s2979_s20, 4096, %s2987_s22, %s2989_s29, %s2867_s8, %s2867_s8, %s2868_s11  }
  0x2c   : > { %p2241_p9 = scmp.ge.s32.totalorder %s2864_s27, 1  ;;  %p256_p1 = scmp.lt.s32.totalorder %s2864_s27, 3 }
  0x2e   : > { %p257_p3 = pnand %p2241_p9, %p256_p1 }
  0x2f   : > { %s3020_s16 = sand.u32 (!%p257_p3), 1, %s2856_s25  }
  0x30   : > { %260 = sbr.rel (%p257_p3) target bundleno = 1243 (0x4db), region = 48  ;;  %s2242_s17 = sshll.u32 (!%p257_p3), %s3020_s16, 8 }
  0x31   : > { %s263_s18 = scalar_lea.sflag (!%p257_p3), [#allocation3], %s3020_s16  ;;  %s3026_s15 = scalar_lea.vmem (!%p257_p3), [#allocation2], %s2242_s17 }
  0x37   : > { %2843 = dma.done.wait (%p2959_p6), %s263_s18, 4096  }
  0x38   : > { %2845 = vsyncadd (%p2959_p6), %s263_s18, 4294963200  ;;  %v2720_v0 = vld [vmem:[%s3964_s1] sm:$0xff]   ;;  %v2721_v1 = vld [vmem:[%s3964_s1 + $0x8] sm:$0xff]   ;;  %vm642_vm0 = vcmask 1040384   ;;  %vm739_vm1 = vcmask 1046528   ;;  %s2869_s8 = smov 32  }
  0x39   : > { %2366 = vmatprep.subr.bf16.mxu0 %v2720_v0  ;;  %v2722_v2 = vld [vmem:[%s3964_s1 + $0x10] sm:$0xff]   ;;  %v2723_v3 = vld [vmem:[%s3964_s1 + $0x18] sm:$0xff]   ;;  %v298_v4 = vld [vmem:[%s3026_s15] sm:$0xff]  ;;  %s2870_s11 = smov 64   ;;  %vm1028_vm2 = vcmask 261120   ;;  %vm1061_vm3 = vcmask 523264  }
  0x3a   : > { %2367 = vmatpush3.bf16.msra.mxu0 %v2720_v0  ;;  %v299_v5 = vld [vmem:[%s3026_s15 + $0x8] sm:$0xff]  ;;  %v2724_v7 = vld [vmem:[%s3964_s1 + $0x20] sm:$0xff]   ;;  %v2726_v9 = vld [vmem:[%s3964_s1 + $0x30] sm:$0xff]   ;;  %vm1158_vm4 = vcmask 785408   ;;  %s2872_s22 = smov 96   ;;  %p3979_p11 = scmp.ne.s32.totalorder %s3975_s13, 0 }
  0x3b   : > { %2368 = vmatprep.subr.bf16.mxu0 %v2721_v1  ;;  %v330_v6 = vpack.c.bf16 %v299_v5, %v298_v4  ;;  %v2725_v8 = vld [vmem:[%s3964_s1 + $0x28] sm:$0xff]   ;;  %v2727_v10 = vld [vmem:[%s3964_s1 + $0x38] sm:$0xff]   ;;  %v300_v11 = vld [vmem:[%s3026_s15 + $0x10] sm:$0xff]  ;;  %s2873_s23 = smov [#allocation5]  }
  0x3c   : > { %v301_v12 = vld [vmem:[%s3026_s15 + $0x18] sm:$0xff]  ;;  %v302_v13 = vld [vmem:[%s3026_s15 + $0x20] sm:$0xff]  ;;  %v303_v14 = vld [vmem:[%s3026_s15 + $0x28] sm:$0xff]  ;;  %s2802_s29 = sshll.u32 %s2873_s23, 4  ;;  %s2803_s29 = int_to_ptr.vmem [resolvable:$false] %s2802_s29 }
  0x3d   : > { %2382 = vmatprep.mubr.bf16.mxu0 %v330_v6  ;;  %v331_v15 = vpack.c.bf16 %v301_v12, %v300_v11  ;;  %v332_v16 = vpack.c.bf16 %v303_v14, %v302_v13  ;;  %v304_v17 = vld [vmem:[%s3026_s15 + $0x30] sm:$0xff]  ;;  %v305_v18 = vld [vmem:[%s3026_s15 + $0x38] sm:$0xff]  ;;  %v306_v19 = vld [vmem:[%s3026_s15 + $0x40] sm:$0xff]  ;;  %s2804_s19 = scalar_lea.vmem %s2803_s29, 8192 }
  0x3e   : > { %2369 = vmatpush3.bf16.msra.mxu0 %v2721_v1  ;;  %v307_v20 = vld [vmem:[%s3026_s15 + $0x48] sm:$0xff]  ;;  %v333_v21 = vpack.c.bf16 %v305_v18, %v304_v17  ;;  %v308_v23 = vld [vmem:[%s3026_s15 + $0x50] sm:$0xff]  ;;  %v309_v24 = vld [vmem:[%s3026_s15 + $0x58] sm:$0xff] }
  0x3f   : > { %2370 = vmatprep.subr.bf16.mxu0 %v2722_v2  ;;  %v334_v22 = vpack.c.bf16 %v307_v20, %v306_v19  ;;  %v310_v25 = vld [vmem:[%s3026_s15 + $0x60] sm:$0xff]  ;;  %v311_v26 = vld [vmem:[%s3026_s15 + $0x68] sm:$0xff]  ;;  %v335_v27 = vpack.c.bf16 %v309_v24, %v308_v23  ;;  %v312_v29 = vld [vmem:[%s3026_s15 + $0x70] sm:$0xff] }
  0x40   : > { %v336_v28 = vpack.c.bf16 %v311_v26, %v310_v25  ;;  %v313_v30 = vld [vmem:[%s3026_s15 + $0x78] sm:$0xff]  ;;  %v314_v31 = vld [vmem:[%s3026_s15 + $0x80] sm:$0xff]  ;;  %v315_v32 = vld [vmem:[%s3026_s15 + $0x88] sm:$0xff] }
  0x41   : > { %v337_v33 = vpack.c.bf16 %v313_v30, %v312_v29  ;;  %v338_v34 = vpack.c.bf16 %v315_v32, %v314_v31  ;;  %v316_v35 = vld [vmem:[%s3026_s15 + $0x90] sm:$0xff]  ;;  %v317_v36 = vld [vmem:[%s3026_s15 + $0x98] sm:$0xff]  ;;  %v318_v37 = vld [vmem:[%s3026_s15 + $0xa0] sm:$0xff] }
  0x42   : > { %2371 = vmatpush3.bf16.msra.mxu0 %v2722_v2  ;;  %v319_v38 = vld [vmem:[%s3026_s15 + $0xa8] sm:$0xff]  ;;  %v339_v39 = vpack.c.bf16 %v317_v36, %v316_v35  ;;  %v320_v41 = vld [vmem:[%s3026_s15 + $0xb0] sm:$0xff]  ;;  %v321_v42 = vld [vmem:[%s3026_s15 + $0xb8] sm:$0xff] }
  0x43   : > { %2372 = vmatprep.subr.bf16.mxu0 %v2723_v3  ;;  %v340_v40 = vpack.c.bf16 %v319_v38, %v318_v37  ;;  %v322_v43 = vld [vmem:[%s3026_s15 + $0xc0] sm:$0xff]  ;;  %v323_v44 = vld [vmem:[%s3026_s15 + $0xc8] sm:$0xff]  ;;  %v341_v45 = vpack.c.bf16 %v321_v42, %v320_v41  ;;  %v324_v47 = vld [vmem:[%s3026_s15 + $0xd0] sm:$0xff] }
  0x44   : > { %v342_v46 = vpack.c.bf16 %v323_v44, %v322_v43  ;;  %v325_v48 = vld [vmem:[%s3026_s15 + $0xd8] sm:$0xff]  ;;  %v326_v49 = vld [vmem:[%s3026_s15 + $0xe0] sm:$0xff]  ;;  %v327_v50 = vld [vmem:[%s3026_s15 + $0xe8] sm:$0xff] }
  0x45   : > { %v343_v51 = vpack.c.bf16 %v325_v48, %v324_v47  ;;  %v344_v52 = vpack.c.bf16 %v327_v50, %v326_v49  ;;  %v328_v53 = vld [vmem:[%s3026_s15 + $0xf0] sm:$0xff]  ;;  %v329_v54 = vld [vmem:[%s3026_s15 + $0xf8] sm:$0xff]  ;;  %v2728_v56 = vld [vmem:[%s3965_s2] sm:$0xff]  }
  0x46   : > { %2373 = vmatpush3.bf16.msra.mxu0 %v2723_v3  ;;  %v345_v55 = vpack.c.bf16 %v329_v54, %v328_v53  ;;  %2494 = vmatprep.subr.bf16.mxu1 %v2728_v56  ;;  %v2729_v57 = vld [vmem:[%s3965_s2 + $0x8] sm:$0xff]   ;;  %v2730_v58 = vld [vmem:[%s3965_s2 + $0x10] sm:$0xff]   ;;  %v2731_v59 = vld [vmem:[%s3965_s2 + $0x18] sm:$0xff]  }
  0x47   : > { %2374 = vmatprep.subr.bf16.mxu0 %v2724_v7  ;;  %2500 = vmatpush3.bf16.msra.mxu1 %v2728_v56  ;;  %v2732_v60 = vld [vmem:[%s3965_s2 + $0x20] sm:$0xff]   ;;  %v2733_v62 = vld [vmem:[%s3965_s2 + $0x28] sm:$0xff]  }
  0x48   : > { %2495 = vmatprep.subr.bf16.mxu1 %v2729_v57  ;;  %v3106_v61 = vld [vmem:[%s3967_s4] ss:$0 sm:$0xff] }
  0x4a   : > { %2375 = vmatpush3.bf16.msra.mxu0 %v2724_v7 }
  0x4b   : > { %2376 = vmatprep.subr.bf16.mxu0 %v2725_v8  ;;  %2501 = vmatpush3.bf16.msra.mxu1 %v2729_v57 }
  0x4c   : > { %2496 = vmatprep.subr.bf16.mxu1 %v2730_v58 }
  0x4e   : > { %2377 = vmatpush3.bf16.msra.mxu0 %v2725_v8 }
  0x4f   : > { %2378 = vmatprep.subr.bf16.mxu0 %v2726_v9  ;;  %2502 = vmatpush3.bf16.msra.mxu1 %v2730_v58 }
  0x50   : > { %2497 = vmatprep.subr.bf16.mxu1 %v2731_v59 }
  0x52   : > { %2379 = vmatpush3.bf16.msra.mxu0 %v2726_v9 }
  0x53   : > { %2380 = vmatprep.subr.bf16.mxu0 %v2727_v10  ;;  %2503 = vmatpush3.bf16.msra.mxu1 %v2731_v59 }
  0x54   : > { %2498 = vmatprep.subr.bf16.mxu1 %v2732_v60 }
  0x56   : > { %2381 = vmatpush3.bf16.msra.mxu0 %v2727_v10 }
  0x57   : > { %2414 = vmatprep.subr.bf16.mxu0 %v2728_v56  ;;  %2504 = vmatpush3.bf16.msra.mxu1 %v2732_v60 }
  0x58   : > { %2499 = vmatprep.subr.bf16.mxu1 %v2733_v62 }
  0x59   : > { %2383 = vmatmul.mubr.bf16.vlgmr.msra.gmra.mrb[0].mxu0 %v331_v15 }
  0x5a   : > { %2386 = vmatprep.mubr.bf16.mxu0 %v332_v16  ;;  %2415 = vmatpush3.bf16.msra.mxu0 %v2728_v56 }
  0x5b   : > { %2416 = vmatprep.subr.bf16.mxu0 %v2729_v57  ;;  %2505 = vmatpush3.bf16.msra.mxu1 %v2733_v62 }
  0x5e   : > { %2417 = vmatpush3.bf16.msra.mxu0 %v2729_v57 }
  0x5f   : > { %2418 = vmatprep.subr.bf16.mxu0 %v2730_v58 }
  0x61   : > { %2387 = vmatmul.mubr.bf16.gmra.mrb[4].mxu0 %v333_v21 }
  0x62   : > { %2390 = vmatprep.mubr.bf16.mxu0 %v334_v22  ;;  %2419 = vmatpush3.bf16.msra.mxu0 %v2730_v58 }
  0x63   : > { %2420 = vmatprep.subr.bf16.mxu0 %v2731_v59 }
  0x66   : > { %2421 = vmatpush3.bf16.msra.mxu0 %v2731_v59 }
  0x67   : > { %2422 = vmatprep.subr.bf16.mxu0 %v2732_v60 }
  0x69   : > { %2391 = vmatmul.mubr.bf16.gmra.mrb[8].mxu0 %v335_v27 }
  0x6a   : > { %2394 = vmatprep.mubr.bf16.mxu0 %v336_v28  ;;  %2423 = vmatpush3.bf16.msra.mxu0 %v2732_v60 }
  0x6b   : > { %2424 = vmatprep.subr.bf16.mxu0 %v2733_v62 }
  0x6e   : > { %2425 = vmatpush3.bf16.msra.mxu0 %v2733_v62 }
  0x71   : > { %2395 = vmatmul.mubr.bf16.gmra.mrb[12].mxu0 %v337_v33 }
  0x72   : > { %2398 = vmatprep.mubr.bf16.mxu0 %v338_v34 }
  0x79   : > { %2399 = vmatmul.mubr.bf16.gmra.mrb[16].mxu0 %v339_v39 }
  0x7a   : > { %2402 = vmatprep.mubr.bf16.mxu0 %v340_v40 }
  0x81   : > { %2403 = vmatmul.mubr.bf16.gmra.mrb[20].mxu0 %v341_v45 }
  0x82   : > { %2406 = vmatprep.mubr.bf16.mxu0 %v342_v46 }
  0x89   : > { %2407 = vmatmul.mubr.bf16.gmra.mrb[24].mxu0 %v343_v51 }
  0x8a   : > { %2410 = vmatprep.mubr.bf16.mxu0 %v344_v52 }
  0x91   : > { %2411 = vmatmul.mubr.bf16.gmra.mrb[28].mxu0 %v345_v55 }
 0x12c   : > { %v2384_v63 = vpop.f32.mrb[0].mxu0 }
 0x12d   : > { %v460_v0 = vadd.f32 %v2384_v63, %v3106_v61  ;;  %v451_v1 = vpop.f32.mrb[1].mxu0 }
 0x12e   : > { %v452_v2 = vadd.f32 %v3106_v61, %v451_v1  ;;  %v2385_v3 = vpop.f32.mrb[2].mxu0 }
 0x12f   : > { %v3113_v4 = vmax.f32 %v460_v0, 0.0  ;;  %v463_v5 = vadd.f32 %v2385_v3, %v3106_v61  ;;  %v454_v6 = vpop.f32.mrb[3].mxu0 }
 0x130   : > { %v3116_v7 = vmax.f32 %v452_v2, 0.0  ;;  %v455_v8 = vadd.f32 %v3106_v61, %v454_v6 }
 0x131   : > { %v581_v9 = vmax.f32 %v463_v5, 0.0  ;;  %v646_v10 = vrot.slane %v3113_v4, 7  ;;  %v743_v11 = vrot.slane %v3113_v4, 1 }
 0x132   : > { %v579_v12 = vmax.f32 %v455_v8, 0.0  ;;  %v643_v13 = vrot.slane %v3116_v7, 7  ;;  %v740_v17 = vrot.slane %v3116_v7, 1 }
 0x133   : > { %v647_v14 = vrot.slane %v581_v9, 7  ;;  %v744_v15 = vrot.slane %v581_v9, 1  ;;  %v2565_v16 = vpack.i.bf16 %v581_v9, %v3113_v4 }
 0x134   : > { %v644_v18 = vrot.slane %v579_v12, 7  ;;  %v2388_v19 = vpop.f32.mrb[4].mxu0  ;;  %v2560_v20 = vpack.i.bf16 %v579_v12, %v3116_v7  ;;  %v741_v21 = vrot.slane %v579_v12, 1  ;;  %v724_v7 = vsel %vm642_vm0, 0.0, %v646_v10 }
 0x135   : > { %v3128_v22 = vsel %vm642_vm0, %v646_v10, %v647_v14  ;;  %v476_v23 = vadd.f32 %v2388_v19, %v3106_v61  ;;  %v467_v24 = vpop.f32.mrb[5].mxu0  ;;  %v745_v25 = vsel %vm739_vm1, %v743_v11, %v744_v15  ;;  %v805_v26 = vsel %vm739_vm1, %v744_v15, 0.0 }
 0x136   : > { %v3136_v27 = vsel %vm642_vm0, %v643_v13, %v644_v18  ;;  %v468_v28 = vadd.f32 %v3106_v61, %v467_v24  ;;  %v2389_v29 = vpop.f32.mrb[6].mxu0  ;;  %2561 = vrot.lane.b32.xlu0 %v2560_v20, %s2869_s8  ;;  %v742_v30 = vsel %vm739_vm1, %v740_v17, %v741_v21  ;;  %v804_v31 = vsel %vm739_vm1, %v741_v21, 0.0 }
 0x137   : > { %v3142_v32 = vmax.f32 %v476_v23, 0.0  ;;  %v479_v33 = vadd.f32 %v2389_v29, %v3106_v61  ;;  %v470_v34 = vpop.f32.mrb[7].mxu0  ;;  %v2570_v35 = vpack.i.bf16 %v804_v31, %v742_v30  ;;  %v2575_v36 = vpack.i.bf16 %v805_v26, %v745_v25 }
 0x138   : > { %v3145_v37 = vmax.f32 %v468_v28, 0.0  ;;  %v471_v38 = vadd.f32 %v3106_v61, %v470_v34 }
 0x139   : > { %v652_v39 = vrot.slane %v3142_v32, 7  ;;  %v749_v40 = vrot.slane %v3142_v32, 1  ;;  %v585_v41 = vmax.f32 %v479_v33, 0.0  ;;  %2571 = vrot.lane.b32.xlu1 %v2570_v35, %s2870_s11 }
 0x13a   : > { %v649_v42 = vrot.slane %v3145_v37, 7  ;;  %v746_v43 = vrot.slane %v3145_v37, 1  ;;  %v583_v44 = vmax.f32 %v471_v38, 0.0  ;;  %2566 = vrot.lane.b32.xlu0 %v2565_v16, %s2869_s8 }
 0x13b   : > { %v653_v45 = vrot.slane %v585_v41, 7  ;;  %v750_v46 = vrot.slane %v585_v41, 1  ;;  %v2580_v47 = vpack.i.bf16 %v585_v41, %v3142_v32 }
 0x13c   : > { %v650_v48 = vrot.slane %v583_v44, 7  ;;  %v747_v49 = vrot.slane %v583_v44, 1  ;;  %v2392_v50 = vpop.f32.mrb[8].mxu0  ;;  %v2585_v51 = vpack.i.bf16 %v583_v44, %v3145_v37  ;;  %v725_v10 = vsel %vm642_vm0, 0.0, %v649_v42 }
 0x13d   : > { %v3159_v52 = vsel %vm642_vm0, %v652_v39, %v653_v45  ;;  %v492_v53 = vadd.f32 %v2392_v50, %v3106_v61  ;;  %v483_v54 = vpop.f32.mrb[9].mxu0  ;;  %2576 = vrot.lane.b32.xlu1 %v2575_v36, %s2870_s11  ;;  %v751_v55 = vsel %vm739_vm1, %v749_v40, %v750_v46  ;;  %v807_v56 = vsel %vm739_vm1, %v750_v46, 0.0 }
 0x13e   : > { %v3168_v57 = vsel %vm642_vm0, %v649_v42, %v650_v48  ;;  %v484_v58 = vadd.f32 %v3106_v61, %v483_v54  ;;  %v2393_v59 = vpop.f32.mrb[10].mxu0  ;;  %2586 = vrot.lane.b32.xlu0 %v2585_v51, %s2869_s8  ;;  %v748_v60 = vsel %vm739_vm1, %v746_v43, %v747_v49  ;;  %v806_v62 = vsel %vm739_vm1, %v747_v49, 0.0 }
 0x13f   : > { %v3174_v63 = vmax.f32 %v492_v53, 0.0  ;;  %v495_v0 = vadd.f32 %v2393_v59, %v3106_v61  ;;  %v486_v1 = vpop.f32.mrb[11].mxu0  ;;  %v2595_v2 = vpack.i.bf16 %v806_v62, %v748_v60  ;;  %v2590_v3 = vpack.i.bf16 %v807_v56, %v751_v55 }
 0x140   : > { %v3177_v5 = vmax.f32 %v484_v58, 0.0  ;;  %v487_v6 = vadd.f32 %v3106_v61, %v486_v1  ;;  %v726_v37 = vsel %vm642_vm0, 0.0, %v652_v39 }
 0x141   : > { %v658_v8 = vrot.slane %v3174_v63, 7  ;;  %v755_v9 = vrot.slane %v3174_v63, 1  ;;  %v589_v11 = vmax.f32 %v495_v0, 0.0  ;;  %2581 = vrot.lane.b32.xlu1 %v2580_v47, %s2869_s8 }
 0x142   : > { %v655_v12 = vrot.slane %v3177_v5, 7  ;;  %v752_v14 = vrot.slane %v3177_v5, 1  ;;  %v587_v15 = vmax.f32 %v487_v6, 0.0  ;;  %2596 = vrot.lane.b32.xlu0 %v2595_v2, %s2870_s11 }
 0x143   : > { %v659_v16 = vrot.slane %v589_v11, 7  ;;  %v756_v17 = vrot.slane %v589_v11, 1  ;;  %v2600_v18 = vpack.i.bf16 %v589_v11, %v3174_v63 }
 0x144   : > { %v656_v19 = vrot.slane %v587_v15, 7  ;;  %v753_v20 = vrot.slane %v587_v15, 1  ;;  %v2396_v21 = vpop.f32.mrb[12].mxu0  ;;  %v2605_v23 = vpack.i.bf16 %v587_v15, %v3177_v5  ;;  %v727_v39 = vsel %vm642_vm0, 0.0, %v655_v12 }
 0x145   : > { %v3191_v24 = vsel %vm642_vm0, %v658_v8, %v659_v16  ;;  %v508_v25 = vadd.f32 %v2396_v21, %v3106_v61  ;;  %v499_v26 = vpop.f32.mrb[13].mxu0  ;;  %2591 = vrot.lane.b32.xlu1 %v2590_v3, %s2870_s11  ;;  %v757_v28 = vsel %vm739_vm1, %v755_v9, %v756_v17  ;;  %v809_v29 = vsel %vm739_vm1, %v756_v17, 0.0 }
 0x146   : > { %v3200_v30 = vsel %vm642_vm0, %v655_v12, %v656_v19  ;;  %v500_v31 = vadd.f32 %v3106_v61, %v499_v26  ;;  %v2397_v33 = vpop.f32.mrb[14].mxu0  ;;  %2606 = vrot.lane.b32.xlu0 %v2605_v23, %s2869_s8  ;;  %v754_v34 = vsel %vm739_vm1, %v752_v14, %v753_v20  ;;  %v808_v35 = vsel %vm739_vm1, %v753_v20, 0.0 }
 0x147   : > { %v3206_v36 = vmax.f32 %v508_v25, 0.0  ;;  %v511_v38 = vadd.f32 %v2397_v33, %v3106_v61  ;;  %v502_v40 = vpop.f32.mrb[15].mxu0  ;;  %v2615_v41 = vpack.i.bf16 %v808_v35, %v754_v34  ;;  %v2610_v43 = vpack.i.bf16 %v809_v29, %v757_v28 }
 0x148   : > { %v3209_v44 = vmax.f32 %v500_v31, 0.0  ;;  %v503_v45 = vadd.f32 %v3106_v61, %v502_v40  ;;  %v728_v5 = vsel %vm642_vm0, 0.0, %v658_v8 }
 0x149   : > { %v664_v46 = vrot.slane %v3206_v36, 7  ;;  %v761_v47 = vrot.slane %v3206_v36, 1  ;;  %v593_v48 = vmax.f32 %v511_v38, 0.0  ;;  %2601 = vrot.lane.b32.xlu1 %v2600_v18, %s2869_s8 }
 0x14a   : > { %v758_v49 = vrot.slane %v3209_v44, 1  ;;  %v591_v50 = vmax.f32 %v503_v45, 0.0  ;;  %2616 = vrot.lane.b32.xlu0 %v2615_v41, %s2870_s11  ;;  %v661_v51 = vrot.slane %v3209_v44, 7 }
 0x14b   : > { %v665_v53 = vrot.slane %v593_v48, 7  ;;  %v762_v54 = vrot.slane %v593_v48, 1  ;;  %v2620_v55 = vpack.i.bf16 %v593_v48, %v3206_v36 }
 0x14c   : > { %v662_v56 = vrot.slane %v591_v50, 7  ;;  %v759_v58 = vrot.slane %v591_v50, 1  ;;  %v2400_v59 = vpop.f32.mrb[16].mxu0  ;;  %v2625_v60 = vpack.i.bf16 %v591_v50, %v3209_v44  ;;  %v730_v44 = vsel %vm642_vm0, 0.0, %v664_v46 }
 0x14d   : > { %v524_v62 = vadd.f32 %v2400_v59, %v3106_v61  ;;  %v515_v0 = vpop.f32.mrb[17].mxu0  ;;  %2611 = vrot.lane.b32.xlu1 %v2610_v43, %s2870_s11  ;;  %v763_v1 = vsel %vm739_vm1, %v761_v47, %v762_v54  ;;  %v811_v2 = vsel %vm739_vm1, %v762_v54, 0.0  ;;  %v3227_v3 = vsel %vm642_vm0, %v664_v46, %v665_v53 }
 0x14e   : > { %v516_v6 = vadd.f32 %v3106_v61, %v515_v0  ;;  %v2401_v9 = vpop.f32.mrb[18].mxu0  ;;  %2626 = vrot.lane.b32.xlu0 %v2625_v60, %s2869_s8  ;;  %v760_v11 = vsel %vm739_vm1, %v758_v49, %v759_v58  ;;  %v810_v14 = vsel %vm739_vm1, %v759_v58, 0.0  ;;  %v2630_v15 = vpack.i.bf16 %v811_v2, %v763_v1 }
 0x14f   : > { %v3233_v16 = vmax.f32 %v524_v62, 0.0  ;;  %v527_v17 = vadd.f32 %v2401_v9, %v3106_v61  ;;  %v518_v18 = vpop.f32.mrb[19].mxu0  ;;  %v2635_v19 = vpack.i.bf16 %v810_v14, %v760_v11  ;;  %v3239_v20 = vsel %vm642_vm0, %v661_v51, %v662_v56 }
 0x150   : > { %v3241_v21 = vmax.f32 %v516_v6, 0.0  ;;  %v519_v23 = vadd.f32 %v3106_v61, %v518_v18 }
 0x151   : > { %v670_v25 = vrot.slane %v3233_v16, 7  ;;  %v767_v26 = vrot.slane %v3233_v16, 1  ;;  %v597_v28 = vmax.f32 %v527_v17, 0.0  ;;  %2621 = vrot.lane.b32.xlu1 %v2620_v55, %s2869_s8 }
 0x152   : > { %v764_v29 = vrot.slane %v3241_v21, 1  ;;  %v595_v31 = vmax.f32 %v519_v23, 0.0  ;;  %2636 = vrot.lane.b32.xlu0 %v2635_v19, %s2870_s11  ;;  %v667_v33 = vrot.slane %v3241_v21, 7 }
 0x153   : > { %v671_v34 = vrot.slane %v597_v28, 7  ;;  %v768_v35 = vrot.slane %v597_v28, 1  ;;  %v2640_v38 = vpack.i.bf16 %v597_v28, %v3233_v16 }
 0x154   : > { %v668_v40 = vrot.slane %v595_v31, 7  ;;  %v765_v41 = vrot.slane %v595_v31, 1  ;;  %v2404_v43 = vpop.f32.mrb[20].mxu0  ;;  %v2645_v45 = vpack.i.bf16 %v595_v31, %v3241_v21  ;;  %v731_v46 = vsel %vm642_vm0, 0.0, %v667_v33 }
 0x155   : > { %v540_v47 = vadd.f32 %v2404_v43, %v3106_v61  ;;  %v531_v48 = vpop.f32.mrb[21].mxu0  ;;  %2631 = vrot.lane.b32.xlu1 %v2630_v15, %s2870_s11  ;;  %v769_v49 = vsel %vm739_vm1, %v767_v26, %v768_v35  ;;  %v813_v50 = vsel %vm739_vm1, %v768_v35, 0.0  ;;  %v3259_v53 = vsel %vm642_vm0, %v670_v25, %v671_v34 }
 0x156   : > { %v532_v54 = vadd.f32 %v3106_v61, %v531_v48  ;;  %v2405_v55 = vpop.f32.mrb[22].mxu0  ;;  %2646 = vrot.lane.b32.xlu0 %v2645_v45, %s2869_s8  ;;  %v766_v56 = vsel %vm739_vm1, %v764_v29, %v765_v41  ;;  %v812_v58 = vsel %vm739_vm1, %v765_v41, 0.0  ;;  %v2650_v59 = vpack.i.bf16 %v813_v50, %v769_v49 }
 0x157   : > { %v3265_v60 = vmax.f32 %v540_v47, 0.0  ;;  %v543_v62 = vadd.f32 %v2405_v55, %v3106_v61  ;;  %v534_v0 = vpop.f32.mrb[23].mxu0  ;;  %v2655_v1 = vpack.i.bf16 %v812_v58, %v766_v56  ;;  %v3271_v2 = vsel %vm642_vm0, %v667_v33, %v668_v40 }
 0x158   : > { %v3273_v6 = vmax.f32 %v532_v54, 0.0  ;;  %v535_v9 = vadd.f32 %v3106_v61, %v534_v0  ;;  %v732_v21 = vsel %vm642_vm0, 0.0, %v670_v25 }
 0x159   : > { %v676_v11 = vrot.slane %v3265_v60, 7  ;;  %v773_v14 = vrot.slane %v3265_v60, 1  ;;  %v601_v15 = vmax.f32 %v543_v62, 0.0  ;;  %2641 = vrot.lane.b32.xlu1 %v2640_v38, %s2869_s8 }
 0x15a   : > { %v770_v17 = vrot.slane %v3273_v6, 1  ;;  %v599_v18 = vmax.f32 %v535_v9, 0.0  ;;  %2656 = vrot.lane.b32.xlu0 %v2655_v1, %s2870_s11  ;;  %v673_v19 = vrot.slane %v3273_v6, 7 }
 0x15b   : > { %v677_v23 = vrot.slane %v601_v15, 7  ;;  %v774_v26 = vrot.slane %v601_v15, 1  ;;  %v2660_v28 = vpack.i.bf16 %v601_v15, %v3265_v60 }
 0x15c   : > { %v674_v29 = vrot.slane %v599_v18, 7  ;;  %v771_v31 = vrot.slane %v599_v18, 1  ;;  %v2408_v34 = vpop.f32.mrb[24].mxu0  ;;  %v2665_v35 = vpack.i.bf16 %v599_v18, %v3273_v6  ;;  %v733_v25 = vsel %vm642_vm0, 0.0, %v673_v19 }
 0x15d   : > { %v556_v40 = vadd.f32 %v2408_v34, %v3106_v61  ;;  %v547_v41 = vpop.f32.mrb[25].mxu0  ;;  %2651 = vrot.lane.b32.xlu1 %v2650_v59, %s2870_s11  ;;  %v775_v38 = vsel %vm739_vm1, %v773_v14, %v774_v26  ;;  %v815_v43 = vsel %vm739_vm1, %v774_v26, 0.0  ;;  %v3291_v45 = vsel %vm642_vm0, %v676_v11, %v677_v23 }
 0x15e   : > { %v548_v47 = vadd.f32 %v3106_v61, %v547_v41  ;;  %v2409_v48 = vpop.f32.mrb[26].mxu0  ;;  %2666 = vrot.lane.b32.xlu0 %v2665_v35, %s2869_s8  ;;  %v772_v49 = vsel %vm739_vm1, %v770_v17, %v771_v31  ;;  %v814_v50 = vsel %vm739_vm1, %v771_v31, 0.0  ;;  %v2670_v54 = vpack.i.bf16 %v815_v43, %v775_v38 }
 0x15f   : > { %v3297_v55 = vmax.f32 %v556_v40, 0.0  ;;  %v559_v56 = vadd.f32 %v2409_v48, %v3106_v61  ;;  %v550_v58 = vpop.f32.mrb[27].mxu0  ;;  %v2675_v59 = vpack.i.bf16 %v814_v50, %v772_v49  ;;  %v3303_v62 = vsel %vm642_vm0, %v673_v19, %v674_v29 }
 0x160   : > { %v3305_v0 = vmax.f32 %v548_v47, 0.0  ;;  %v551_v1 = vadd.f32 %v3106_v61, %v550_v58  ;;  %v734_v6 = vsel %vm642_vm0, 0.0, %v676_v11 }
 0x161   : > { %v682_v9 = vrot.slane %v3297_v55, 7  ;;  %v779_v14 = vrot.slane %v3297_v55, 1  ;;  %v605_v15 = vmax.f32 %v559_v56, 0.0  ;;  %2661 = vrot.lane.b32.xlu1 %v2660_v28, %s2869_s8 }
 0x162   : > { %v776_v17 = vrot.slane %v3305_v0, 1  ;;  %v603_v18 = vmax.f32 %v551_v1, 0.0  ;;  %2676 = vrot.lane.b32.xlu0 %v2675_v59, %s2870_s11  ;;  %v679_v23 = vrot.slane %v3305_v0, 7 }
 0x163   : > { %v683_v26 = vrot.slane %v605_v15, 7  ;;  %v780_v29 = vrot.slane %v605_v15, 1  ;;  %v2680_v31 = vpack.i.bf16 %v605_v15, %v3297_v55 }
 0x164   : > { %v680_v34 = vrot.slane %v603_v18, 7  ;;  %v777_v35 = vrot.slane %v603_v18, 1  ;;  %v2412_v40 = vpop.f32.mrb[28].mxu0  ;;  %v2685_v41 = vpack.i.bf16 %v603_v18, %v3305_v0  ;;  %v735_v11 = vsel %vm642_vm0, 0.0, %v679_v23 }
 0x165   : > { %v572_v38 = vadd.f32 %v2412_v40, %v3106_v61  ;;  %v563_v43 = vpop.f32.mrb[29].mxu0  ;;  %2671 = vrot.lane.b32.xlu1 %v2670_v54, %s2870_s11  ;;  %v781_v28 = vsel %vm739_vm1, %v779_v14, %v780_v29  ;;  %v817_v47 = vsel %vm739_vm1, %v780_v29, 0.0  ;;  %v3323_v48 = vsel %vm642_vm0, %v682_v9, %v683_v26 }
 0x166   : > { %v564_v49 = vadd.f32 %v3106_v61, %v563_v43  ;;  %v2413_v50 = vpop.f32.mrb[30].mxu0  ;;  %2686 = vrot.lane.b32.xlu0 %v2685_v41, %s2869_s8  ;;  %v778_v56 = vsel %vm739_vm1, %v776_v17, %v777_v35  ;;  %v816_v58 = vsel %vm739_vm1, %v777_v35, 0.0  ;;  %v2690_v59 = vpack.i.bf16 %v817_v47, %v781_v28 }
 0x167   : > { %v3329_v54 = vmax.f32 %v572_v38, 0.0  ;;  %v575_v1 = vadd.f32 %v2413_v50, %v3106_v61  ;;  %v566_v14 = vpop.f32.mrb[31].mxu0  ;;  %v2695_v15 = vpack.i.bf16 %v816_v58, %v778_v56  ;;  %v3335_v18 = vsel %vm642_vm0, %v679_v23, %v680_v34 }
 0x168   : > { %v3337_v26 = vmax.f32 %v564_v49, 0.0  ;;  %v567_v29 = vadd.f32 %v3106_v61, %v566_v14  ;;  %v736_v0 = vsel %vm642_vm0, 0.0, %v682_v9 }
 0x169   : > { %v688_v17 = vrot.slane %v3329_v54, 7  ;;  %v785_v35 = vrot.slane %v3329_v54, 1  ;;  %v609_v40 = vmax.f32 %v575_v1, 0.0  ;;  %2681 = vrot.lane.b32.xlu1 %v2680_v31, %s2869_s8 }
 0x16a   : > { %v685_v41 = vrot.slane %v3337_v26, 7  ;;  %v782_v38 = vrot.slane %v3337_v26, 1  ;;  %v607_v43 = vmax.f32 %v567_v29, 0.0  ;;  %2696 = vrot.lane.b32.xlu0 %v2695_v15, %s2870_s11 }
 0x16b   : > { %v689_v34 = vrot.slane %v609_v40, 7  ;;  %v786_v28 = vrot.slane %v609_v40, 1  ;;  %v2700_v47 = vpack.i.bf16 %v609_v40, %v3329_v54  ;;  %v2275_v40 = vld [vmem:[%s3968_s5] ss:$0 sm:$0xff] }
 0x16c   : > { %v686_v49 = vrot.slane %v607_v43, 7  ;;  %v783_v61 = vrot.slane %v607_v43, 1  ;;  %v2705_v50 = vpack.i.bf16 %v607_v43, %v3337_v26  ;;  %v737_v9 = vsel %vm642_vm0, 0.0, %v685_v41 }
 0x16d   : > { %2691 = vrot.lane.b32.xlu1 %v2690_v59, %s2870_s11  ;;  %v787_v56 = vsel %vm739_vm1, %v785_v35, %v786_v28  ;;  %v819_v31 = vsel %vm739_vm1, %v786_v28, 0.0  ;;  %v3354_v58 = vsel %vm642_vm0, %v688_v17, %v689_v34  ;;  %v3972_v35 = vmov 0.0  }
 0x16e   : > { %2706 = vrot.lane.b32.xlu0 %v2705_v50, %s2869_s8  ;;  %v784_v1 = vsel %vm739_vm1, %v782_v38, %v783_v61  ;;  %v818_v14 = vsel %vm739_vm1, %v783_v61, 0.0  ;;  %v2715_v15 = vpack.i.bf16 %v819_v31, %v787_v56  ;;  %v3362_v59 = vsel %vm642_vm0, %v685_v41, %v686_v49 }
 0x16f   : > { %v2710_v29 = vpack.i.bf16 %v818_v14, %v784_v1  ;;  %v738_v26 = vsel %vm642_vm0, 0.0, %v688_v17 }
 0x171   : > { %2701 = vrot.lane.b32.xlu1 %v2700_v47, %s2869_s8  ;;  %v723_v47 = vsel %vm642_vm0, 0.0, %v643_v13 }
 0x172   : > { %2711 = vrot.lane.b32.xlu0 %v2710_v29, %s2870_s11 }
 0x175   : > { %2716 = vrot.lane.b32.xlu1 %v2715_v15, %s2870_s11 }
 0x176   : > { %1399 = vrot.lane.b32.xlu0 %v3972_v35, %s2869_s8 }
 0x179   : > { %1657 = vrot.lane.b32.xlu1 %v2275_v40, %s2869_s8 }
 0x1a8   : > { %v2562_v38 = vpop.permute.xlu0 %2561 }
 0x1a9   : > { %v2564_v43 = vunpack.i.h.bf16 %v2562_v38  ;;  %v2563_v34 = vunpack.i.l.bf16 %v2562_v38 }
 0x1ab   : > { %v2572_v28 = vpop.permute.xlu1 %2571  ;;  %v1029_v56 = vsel %vm1028_vm2, %v723_v47, %v2563_v34  ;;  %v1030_v31 = vsel %vm1028_vm2, %v3136_v27, %v2564_v43 }
 0x1ac   : > { %v2574_v49 = vunpack.i.h.bf16 %v2572_v28  ;;  %v2573_v61 = vunpack.i.l.bf16 %v2572_v28  ;;  %v2567_v50 = vpop.permute.xlu0 %2566 }
 0x1ad   : > { %v2569_v1 = vunpack.i.h.bf16 %v2567_v50  ;;  %v2568_v14 = vunpack.i.l.bf16 %v2567_v50 }
 0x1ae   : > { %v1062_v15 = vsel %vm1061_vm3, %v1029_v56, %v2573_v61  ;;  %v1063_v29 = vsel %vm1061_vm3, %v1030_v31, %v2574_v49 }
 0x1af   : > { %v2577_v40 = vpop.permute.xlu1 %2576  ;;  %v1094_v38 = vpack.c.bf16 %v1063_v29, %v1062_v15  ;;  %v1032_v34 = vsel %vm1028_vm2, %v3128_v22, %v2569_v1  ;;  %v1031_v27 = vsel %vm1028_vm2, %v724_v7, %v2568_v14 }
 0x1b0   : > { %v2579_v13 = vunpack.i.h.bf16 %v2577_v40  ;;  %v2578_v28 = vunpack.i.l.bf16 %v2577_v40  ;;  %v2587_v35 = vpop.permute.xlu0 %2586 }
 0x1b1   : > { %2426 = vmatprep.mubr.msk.bf16.mxu0 %vm1158_vm4, %v1094_v38  ;;  %v2589_v49 = vunpack.i.h.bf16 %v2587_v35  ;;  %v2588_v61 = vunpack.i.l.bf16 %v2587_v35 }
 0x1b2   : > { %v1065_v43 = vsel %vm1061_vm3, %v1032_v34, %v2579_v13  ;;  %v1064_v47 = vsel %vm1061_vm3, %v1031_v27, %v2578_v28 }
 0x1b3   : > { %v1095_v50 = vpack.c.bf16 %v1065_v43, %v1064_v47  ;;  %v2582_v4 = vpop.permute.xlu1 %2581  ;;  %v1034_v14 = vsel %vm1028_vm2, %v3168_v57, %v2589_v49  ;;  %v1033_v29 = vsel %vm1028_vm2, %v725_v10, %v2588_v61 }
 0x1b4   : > { %v2597_v56 = vpop.permute.xlu0 %2596  ;;  %v2584_v31 = vunpack.i.h.bf16 %v2582_v4  ;;  %v2583_v15 = vunpack.i.l.bf16 %v2582_v4 }
 0x1b5   : > { %v2599_v22 = vunpack.i.h.bf16 %v2597_v56  ;;  %v2598_v1 = vunpack.i.l.bf16 %v2597_v56  ;;  %2427 = vmatmul.mubr.msk.bf16.vlgmr.msra.gmra.mrb[32].mxu0 %vm1158_vm4, %v1095_v50 }
 0x1b6   : > { %v1036_v34 = vsel %vm1028_vm2, %v3159_v52, %v2584_v31  ;;  %v1035_v57 = vsel %vm1028_vm2, %v726_v37, %v2583_v15 }
 0x1b7   : > { %v1066_v35 = vsel %vm1061_vm3, %v1033_v29, %v2598_v1  ;;  %v1067_v40 = vsel %vm1061_vm3, %v1034_v14, %v2599_v22  ;;  %v2592_v38 = vpop.permute.xlu1 %2591 }
 0x1b8   : > { %v2594_v42 = vunpack.i.h.bf16 %v2592_v38  ;;  %v2593_v7 = vunpack.i.l.bf16 %v2592_v38  ;;  %v2607_v13 = vpop.permute.xlu0 %2606  ;;  %v1096_v28 = vpack.c.bf16 %v1067_v40, %v1066_v35 }
 0x1b9   : > { %v2609_v47 = vunpack.i.h.bf16 %v2607_v13  ;;  %v2608_v49 = vunpack.i.l.bf16 %v2607_v13 }
 0x1ba   : > { %v1068_v27 = vsel %vm1061_vm3, %v1035_v57, %v2593_v7  ;;  %v1069_v43 = vsel %vm1061_vm3, %v1036_v34, %v2594_v42  ;;  %2430 = vmatprep.mubr.msk.bf16.mxu0 %vm1158_vm4, %v1096_v28  ;;  %v729_v34 = vsel %vm642_vm0, 0.0, %v661_v51 }
 0x1bb   : > { %v2602_v32 = vpop.permute.xlu1 %2601  ;;  %v1097_v61 = vpack.c.bf16 %v1069_v43, %v1068_v27  ;;  %v1038_v31 = vsel %vm1028_vm2, %v3200_v30, %v2609_v47  ;;  %v1037_v15 = vsel %vm1028_vm2, %v727_v39, %v2608_v49 }
 0x1bc   : > { %v2617_v50 = vpop.permute.xlu0 %2616  ;;  %v2604_v4 = vunpack.i.h.bf16 %v2602_v32  ;;  %v2603_v10 = vunpack.i.l.bf16 %v2602_v32 }
 0x1bd   : > { %v2619_v52 = vunpack.i.h.bf16 %v2617_v50  ;;  %v2618_v56 = vunpack.i.l.bf16 %v2617_v50  ;;  %2431 = vmatmul.mubr.msk.bf16.gmra.mrb[36].mxu0 %vm1158_vm4, %v1097_v61 }
 0x1be   : > { %v1040_v38 = vsel %vm1028_vm2, %v3191_v24, %v2604_v4  ;;  %v1039_v30 = vsel %vm1028_vm2, %v728_v5, %v2603_v10 }
 0x1bf   : > { %v1070_v22 = vsel %vm1061_vm3, %v1037_v15, %v2618_v56  ;;  %v1071_v1 = vsel %vm1061_vm3, %v1038_v31, %v2619_v52  ;;  %v2612_v14 = vpop.permute.xlu1 %2611 }
 0x1c0   : > { %v2614_v12 = vunpack.i.h.bf16 %v2612_v14  ;;  %v2613_v29 = vunpack.i.l.bf16 %v2612_v14  ;;  %v2627_v35 = vpop.permute.xlu0 %2626  ;;  %v1098_v40 = vpack.c.bf16 %v1071_v1, %v1070_v22 }
 0x1c1   : > { %v2629_v7 = vunpack.i.h.bf16 %v2627_v35  ;;  %v2628_v13 = vunpack.i.l.bf16 %v2627_v35 }
 0x1c2   : > { %v1072_v37 = vsel %vm1061_vm3, %v1039_v30, %v2613_v29  ;;  %v1073_v42 = vsel %vm1061_vm3, %v1040_v38, %v2614_v12  ;;  %2434 = vmatprep.mubr.msk.bf16.mxu0 %vm1158_vm4, %v1098_v40 }
 0x1c3   : > { %v2622_v63 = vpop.permute.xlu1 %2621  ;;  %v1099_v28 = vpack.c.bf16 %v1073_v42, %v1072_v37  ;;  %v1041_v47 = vsel %vm1028_vm2, %v729_v34, %v2628_v13  ;;  %v1042_v49 = vsel %vm1028_vm2, %v3239_v20, %v2629_v7 }
 0x1c4   : > { %v2637_v8 = vpop.permute.xlu0 %2636  ;;  %v2624_v57 = vunpack.i.h.bf16 %v2622_v63  ;;  %v2623_v27 = vunpack.i.l.bf16 %v2622_v63 }
 0x1c5   : > { %v2639_v24 = vunpack.i.h.bf16 %v2637_v8  ;;  %v2638_v43 = vunpack.i.l.bf16 %v2637_v8  ;;  %2435 = vmatmul.mubr.msk.bf16.gmra.mrb[40].mxu0 %vm1158_vm4, %v1099_v28 }
 0x1c6   : > { %v1044_v52 = vsel %vm1028_vm2, %v3227_v3, %v2624_v57  ;;  %v1043_v56 = vsel %vm1028_vm2, %v730_v44, %v2623_v27 }
 0x1c7   : > { %v2632_v32 = vpop.permute.xlu1 %2631  ;;  %v1074_v61 = vsel %vm1061_vm3, %v1041_v47, %v2638_v43  ;;  %v1075_v39 = vsel %vm1061_vm3, %v1042_v49, %v2639_v24 }
 0x1c8   : > { %v2634_v51 = vunpack.i.h.bf16 %v2632_v32  ;;  %v2633_v50 = vunpack.i.l.bf16 %v2632_v32  ;;  %v2647_v4 = vpop.permute.xlu0 %2646  ;;  %v1100_v10 = vpack.c.bf16 %v1075_v39, %v1074_v61 }
 0x1c9   : > { %v2649_v15 = vunpack.i.h.bf16 %v2647_v4  ;;  %v2648_v22 = vunpack.i.l.bf16 %v2647_v4 }
 0x1ca   : > { %v1076_v20 = vsel %vm1061_vm3, %v1043_v56, %v2633_v50  ;;  %v1077_v31 = vsel %vm1061_vm3, %v1044_v52, %v2634_v51  ;;  %2438 = vmatprep.mubr.msk.bf16.mxu1 %vm1158_vm4, %v1100_v10 }
 0x1cb   : > { %v1101_v36 = vpack.c.bf16 %v1077_v31, %v1076_v20  ;;  %v2642_v1 = vpop.permute.xlu1 %2641  ;;  %v1046_v35 = vsel %vm1028_vm2, %v3271_v2, %v2649_v15  ;;  %v1045_v40 = vsel %vm1028_vm2, %v731_v46, %v2648_v22 }
 0x1cc   : > { %v2657_v14 = vpop.permute.xlu0 %2656  ;;  %v2644_v5 = vunpack.i.h.bf16 %v2642_v1  ;;  %v2643_v12 = vunpack.i.l.bf16 %v2642_v1 }
 0x1cd   : > { %v2659_v3 = vunpack.i.h.bf16 %v2657_v14  ;;  %v2658_v29 = vunpack.i.l.bf16 %v2657_v14  ;;  %2439 = vmatmul.mubr.msk.bf16.vlgmr.msra.gmra.mrb[0].mxu1 %vm1158_vm4, %v1101_v36 }
 0x1ce   : > { %v1048_v63 = vsel %vm1028_vm2, %v3259_v53, %v2644_v5  ;;  %v1047_v2 = vsel %vm1028_vm2, %v732_v21, %v2643_v12 }
 0x1cf   : > { %v1078_v38 = vsel %vm1061_vm3, %v1045_v40, %v2658_v29  ;;  %v1079_v30 = vsel %vm1061_vm3, %v1046_v35, %v2659_v3  ;;  %v2652_v37 = vpop.permute.xlu1 %2651 }
 0x1d0   : > { %v1102_v33 = vpack.c.bf16 %v1079_v30, %v1078_v38  ;;  %v2654_v42 = vunpack.i.h.bf16 %v2652_v37  ;;  %v2653_v7 = vunpack.i.l.bf16 %v2652_v37  ;;  %v2667_v13 = vpop.permute.xlu0 %2666 }
 0x1d1   : > { %v2669_v34 = vunpack.i.h.bf16 %v2667_v13  ;;  %v2668_v57 = vunpack.i.l.bf16 %v2667_v13 }
 0x1d2   : > { %v1080_v28 = vsel %vm1061_vm3, %v1047_v2, %v2653_v7  ;;  %v1081_v8 = vsel %vm1061_vm3, %v1048_v63, %v2654_v42  ;;  %2442 = vmatprep.mubr.msk.bf16.mxu1 %vm1158_vm4, %v1102_v33 }
 0x1d3   : > { %v1103_v16 = vpack.c.bf16 %v1081_v8, %v1080_v28  ;;  %v2662_v27 = vpop.permute.xlu1 %2661  ;;  %v1050_v32 = vsel %vm1028_vm2, %v3303_v62, %v2669_v34  ;;  %v1049_v61 = vsel %vm1028_vm2, %v733_v25, %v2668_v57 }
 0x1d4   : > { %v2677_v24 = vpop.permute.xlu0 %2676  ;;  %v2664_v43 = vunpack.i.h.bf16 %v2662_v27  ;;  %v2663_v47 = vunpack.i.l.bf16 %v2662_v27 }
 0x1d5   : > { %v2679_v53 = vunpack.i.h.bf16 %v2677_v24  ;;  %v2678_v49 = vunpack.i.l.bf16 %v2677_v24  ;;  %2443 = vmatmul.mubr.msk.bf16.gmra.mrb[4].mxu1 %vm1158_vm4, %v1103_v16 }
 0x1d6   : > { %v1052_v52 = vsel %vm1028_vm2, %v3291_v45, %v2664_v43  ;;  %v1051_v62 = vsel %vm1028_vm2, %v734_v6, %v2663_v47 }
 0x1d7   : > { %v1082_v39 = vsel %vm1061_vm3, %v1049_v61, %v2678_v49  ;;  %v1083_v44 = vsel %vm1061_vm3, %v1050_v32, %v2679_v53  ;;  %v2672_v51 = vpop.permute.xlu1 %2671 }
 0x1d8   : > { %v1104_v19 = vpack.c.bf16 %v1083_v44, %v1082_v39  ;;  %v2674_v50 = vunpack.i.h.bf16 %v2672_v51  ;;  %v2673_v4 = vunpack.i.l.bf16 %v2672_v51  ;;  %v2687_v10 = vpop.permute.xlu0 %2686 }
 0x1d9   : > { %v2689_v31 = vunpack.i.h.bf16 %v2687_v10  ;;  %v2688_v15 = vunpack.i.l.bf16 %v2687_v10 }
 0x1da   : > { %v1084_v56 = vsel %vm1061_vm3, %v1051_v62, %v2673_v4  ;;  %v1085_v20 = vsel %vm1061_vm3, %v1052_v52, %v2674_v50  ;;  %2446 = vmatprep.mubr.msk.bf16.mxu1 %vm1158_vm4, %v1104_v19 }
 0x1db   : > { %v1105_v60 = vpack.c.bf16 %v1085_v20, %v1084_v56  ;;  %v2682_v22 = vpop.permute.xlu1 %2681  ;;  %v1054_v5 = vsel %vm1028_vm2, %v3335_v18, %v2689_v31  ;;  %v1053_v12 = vsel %vm1028_vm2, %v735_v11, %v2688_v15 }
 0x1dc   : > { %v2697_v36 = vpop.permute.xlu0 %2696  ;;  %v2684_v1 = vunpack.i.h.bf16 %v2682_v22  ;;  %v2683_v46 = vunpack.i.l.bf16 %v2682_v22 }
 0x1dd   : > { %v2699_v45 = vunpack.i.h.bf16 %v2697_v36  ;;  %v2698_v14 = vunpack.i.l.bf16 %v2697_v36  ;;  %2447 = vmatmul.mubr.msk.bf16.gmra.mrb[8].mxu1 %vm1158_vm4, %v1105_v60 }
 0x1de   : > { %v1056_v37 = vsel %vm1028_vm2, %v3323_v48, %v2684_v1  ;;  %v1055_v18 = vsel %vm1028_vm2, %v736_v0, %v2683_v46 }
 0x1df   : > { %v1086_v3 = vsel %vm1061_vm3, %v1053_v12, %v2698_v14  ;;  %v1087_v29 = vsel %vm1061_vm3, %v1054_v5, %v2699_v45  ;;  %v2692_v35 = vpop.permute.xlu1 %2691 }
 0x1e0   : > { %v1106_v23 = vpack.c.bf16 %v1087_v29, %v1086_v3  ;;  %v2694_v40 = vunpack.i.h.bf16 %v2692_v35  ;;  %v2693_v38 = vunpack.i.l.bf16 %v2692_v35  ;;  %v2707_v30 = vpop.permute.xlu0 %2706 }
 0x1e1   : > { %v2709_v42 = vunpack.i.h.bf16 %v2707_v30  ;;  %v2708_v7 = vunpack.i.l.bf16 %v2707_v30 }
 0x1e2   : > { %v1088_v21 = vsel %vm1061_vm3, %v1055_v18, %v2693_v38  ;;  %v1089_v33 = vsel %vm1061_vm3, %v1056_v37, %v2694_v40  ;;  %2450 = vmatprep.mubr.msk.bf16.mxu1 %vm1158_vm4, %v1106_v23 }
 0x1e3   : > { %v1107_v55 = vpack.c.bf16 %v1089_v33, %v1088_v21  ;;  %v2702_v13 = vpop.permute.xlu1 %2701  ;;  %v1058_v34 = vsel %vm1028_vm2, %v3362_v59, %v2709_v42  ;;  %v1057_v57 = vsel %vm1028_vm2, %v737_v9, %v2708_v7 }
 0x1e4   : > { %v2712_v63 = vpop.permute.xlu0 %2711  ;;  %v2704_v2 = vunpack.i.h.bf16 %v2702_v13  ;;  %v2703_v28 = vunpack.i.l.bf16 %v2702_v13  ;;  %v3978_v13 = vmov 0.0  }
 0x1e5   : > { %v2714_v48 = vunpack.i.h.bf16 %v2712_v63  ;;  %v2713_v8 = vunpack.i.l.bf16 %v2712_v63  ;;  %2451 = vmatmul.mubr.msk.bf16.gmra.mrb[12].mxu1 %vm1158_vm4, %v1107_v55 }
 0x1e6   : > { %v1060_v47 = vsel %vm1028_vm2, %v3354_v58, %v2704_v2  ;;  %v1059_v53 = vsel %vm1028_vm2, %v738_v26, %v2703_v28 }
 0x1e7   : > { %v1090_v16 = vsel %vm1061_vm3, %v1057_v57, %v2713_v8  ;;  %v1091_v27 = vsel %vm1061_vm3, %v1058_v34, %v2714_v48  ;;  %v2717_v25 = vpop.permute.xlu1 %2716  ;;  %v2734_v57 = vld [vmem:[%s3966_s3] sm:$0xff]  }
 0x1e8   : > { %v1108_v41 = vpack.c.bf16 %v1091_v27, %v1090_v16  ;;  %v2719_v24 = vunpack.i.h.bf16 %v2717_v25  ;;  %v2718_v43 = vunpack.i.l.bf16 %v2717_v25  ;;  %v1400_v40 = vpop.permute.xlu0 %1399  ;;  %v2735_v16 = vld [vmem:[%s3966_s3 + $0x8] sm:$0xff]   ;;  %2458 = vmatprep.subr.bf16.mxu1 %v2734_v57 }
 0x1e9   : > { %2459 = vmatpush3.bf16.msra.mxu1 %v2734_v57 }
 0x1ea   : > { %v1092_v59 = vsel %vm1061_vm3, %v1059_v53, %v2718_v43  ;;  %v1093_v49 = vsel %vm1061_vm3, %v1060_v47, %v2719_v24  ;;  %2454 = vmatprep.mubr.msk.bf16.mxu1 %vm1158_vm4, %v1108_v41  ;;  %2460 = vmatprep.subr.bf16.mxu1 %v2735_v16 }
 0x1eb   : > { %v1109_v32 = vpack.c.bf16 %v1093_v49, %v1092_v59  ;;  %v3693_v23 = vpop.permute.xlu1 %1657 }
 0x1ed   : > { %2455 = vmatmul.mubr.msk.bf16.gmra.mrb[16].mxu1 %vm1158_vm4, %v1109_v32 }
 0x1ee   : > { %2461 = vmatpush3.bf16.msra.mxu1 %v2735_v16 }
 0x288   : > { %v3517_v54 = vpop.f32.mrb[32].mxu0 }
 0x289   : > { %1405 = vrot.lane.b32.xlu0 %v3517_v54, %s2869_s8  ;;  %1526 = vrot.lane.b32.xlu1 %v3517_v54, %s2872_s22  ;;  %v3523_v17 = vpop.f32.mrb[33].mxu0 }
 0x28a   : > { %v3525_v58 = vpop.f32.mrb[34].mxu0  ;;  %v1492_v38 = vadd.f32 %v1400_v40, %v3523_v17 }
 0x28b   : > { %v3527_v61 = vpop.f32.mrb[35].mxu0 }
 0x28c   : > { %v1493_v21 = vadd.f32 %v1400_v40, %v3527_v61 }
 0x28d   : > { %1401 = vrot.lane.b32.xlu1 %v3523_v17, %s2869_s8  ;;  %1528 = vrot.lane.b32.xlu0 %v3525_v58, %s2872_s22 }
 0x290   : > { %v3533_v39 = vpop.f32.mrb[36].mxu0 }
 0x291   : > { %1407 = vrot.lane.b32.xlu1 %v3525_v58, %s2869_s8  ;;  %1403 = vrot.lane.b32.xlu0 %v3527_v61, %s2869_s8  ;;  %v3539_v44 = vpop.f32.mrb[37].mxu0 }
 0x292   : > { %v3541_v51 = vpop.f32.mrb[38].mxu0 }
 0x293   : > { %v3543_v6 = vpop.f32.mrb[39].mxu0 }
 0x295   : > { %1534 = vrot.lane.b32.xlu0 %v3533_v39, %s2872_s22  ;;  %1530 = vrot.lane.b32.xlu1 %v3539_v44, %s2872_s22 }
 0x298   : > { %v3549_v19 = vpop.f32.mrb[40].mxu0 }
 0x299   : > { %1413 = vrot.lane.b32.xlu0 %v3533_v39, %s2869_s8  ;;  %1536 = vrot.lane.b32.xlu1 %v3541_v51, %s2872_s22  ;;  %v3555_v50 = vpop.f32.mrb[41].mxu0 }
 0x29a   : > { %v3557_v4 = vpop.f32.mrb[42].mxu0 }
 0x29b   : > { %v3559_v10 = vpop.f32.mrb[43].mxu0 }
 0x29d   : > { %1409 = vrot.lane.b32.xlu0 %v3539_v44, %s2869_s8  ;;  %1415 = vrot.lane.b32.xlu1 %v3541_v51, %s2869_s8 }
 0x2a0   : > { %v3565_v52 = vpop.f32.mrb[0].mxu1 }
 0x2a1   : > { %v3567_v62 = vpop.f32.mrb[1].mxu1  ;;  %1411 = vrot.lane.b32.xlu1 %v3543_v6, %s2869_s8  ;;  %1532 = vrot.lane.b32.xlu0 %v3543_v6, %s2872_s22 }
 0x2a2   : > { %v3573_v56 = vpop.f32.mrb[2].mxu1 }
 0x2a3   : > { %v3575_v20 = vpop.f32.mrb[3].mxu1 }
 0x2a5   : > { %1542 = vrot.lane.b32.xlu0 %v3549_v19, %s2872_s22  ;;  %1544 = vrot.lane.b32.xlu1 %v3557_v4, %s2872_s22 }
 0x2a8   : > { %v3581_v31 = vpop.f32.mrb[4].mxu1 }
 0x2a9   : > { %v3583_v15 = vpop.f32.mrb[5].mxu1  ;;  %1421 = vrot.lane.b32.xlu0 %v3549_v19, %s2869_s8  ;;  %1423 = vrot.lane.b32.xlu1 %v3557_v4, %s2869_s8 }
 0x2aa   : > { %v3589_v60 = vpop.f32.mrb[6].mxu1 }
 0x2ab   : > { %v3591_v22 = vpop.f32.mrb[7].mxu1 }
 0x2ad   : > { %1538 = vrot.lane.b32.xlu0 %v3555_v50, %s2872_s22  ;;  %1540 = vrot.lane.b32.xlu1 %v3559_v10, %s2872_s22 }
 0x2b0   : > { %v3597_v11 = vpop.f32.mrb[8].mxu1 }
 0x2b1   : > { %v3599_v36 = vpop.f32.mrb[9].mxu1  ;;  %1417 = vrot.lane.b32.xlu0 %v3555_v50, %s2869_s8  ;;  %1419 = vrot.lane.b32.xlu1 %v3559_v10, %s2869_s8 }
 0x2b2   : > { %v3605_v1 = vpop.f32.mrb[10].mxu1 }
 0x2b3   : > { %v3607_v46 = vpop.f32.mrb[11].mxu1 }
 0x2b5   : > { %1550 = vrot.lane.b32.xlu0 %v3565_v52, %s2872_s22  ;;  %1552 = vrot.lane.b32.xlu1 %v3573_v56, %s2872_s22 }
 0x2b8   : > { %v3613_v45 = vpop.f32.mrb[12].mxu1 }
 0x2b9   : > { %v3615_v14 = vpop.f32.mrb[13].mxu1  ;;  %1429 = vrot.lane.b32.xlu0 %v3565_v52, %s2869_s8  ;;  %1431 = vrot.lane.b32.xlu1 %v3573_v56, %s2869_s8 }
 0x2ba   : > { %v3621_v5 = vpop.f32.mrb[14].mxu1 }
 0x2bb   : > { %v3623_v12 = vpop.f32.mrb[15].mxu1 }
 0x2bd   : > { %1546 = vrot.lane.b32.xlu0 %v3567_v62, %s2872_s22  ;;  %1548 = vrot.lane.b32.xlu1 %v3575_v20, %s2872_s22 }
 0x2c0   : > { %v3629_v3 = vpop.f32.mrb[16].mxu1 }
 0x2c1   : > { %v3631_v29 = vpop.f32.mrb[17].mxu1  ;;  %1425 = vrot.lane.b32.xlu0 %v3567_v62, %s2869_s8  ;;  %1427 = vrot.lane.b32.xlu1 %v3575_v20, %s2869_s8 }
 0x2c2   : > { %v3637_v35 = vpop.f32.mrb[18].mxu1 }
 0x2c3   : > { %v3639_v0 = vpop.f32.mrb[19].mxu1 }
 0x2c5   : > { %1558 = vrot.lane.b32.xlu0 %v3581_v31, %s2872_s22  ;;  %1560 = vrot.lane.b32.xlu1 %v3589_v60, %s2872_s22 }
 0x2c9   : > { %1437 = vrot.lane.b32.xlu0 %v3581_v31, %s2869_s8  ;;  %1439 = vrot.lane.b32.xlu1 %v3589_v60, %s2869_s8 }
 0x2cd   : > { %1554 = vrot.lane.b32.xlu0 %v3583_v15, %s2872_s22  ;;  %1556 = vrot.lane.b32.xlu1 %v3591_v22, %s2872_s22 }
 0x2d1   : > { %1433 = vrot.lane.b32.xlu0 %v3583_v15, %s2869_s8  ;;  %1435 = vrot.lane.b32.xlu1 %v3591_v22, %s2869_s8 }
 0x2d5   : > { %1566 = vrot.lane.b32.xlu0 %v3597_v11, %s2872_s22  ;;  %1568 = vrot.lane.b32.xlu1 %v3605_v1, %s2872_s22 }
 0x2d9   : > { %1445 = vrot.lane.b32.xlu0 %v3597_v11, %s2869_s8  ;;  %1447 = vrot.lane.b32.xlu1 %v3605_v1, %s2869_s8 }
 0x2dd   : > { %1562 = vrot.lane.b32.xlu0 %v3599_v36, %s2872_s22  ;;  %1564 = vrot.lane.b32.xlu1 %v3607_v46, %s2872_s22 }
 0x2e1   : > { %1441 = vrot.lane.b32.xlu0 %v3599_v36, %s2869_s8  ;;  %1443 = vrot.lane.b32.xlu1 %v3607_v46, %s2869_s8 }
 0x2e5   : > { %1574 = vrot.lane.b32.xlu0 %v3613_v45, %s2872_s22  ;;  %1576 = vrot.lane.b32.xlu1 %v3621_v5, %s2872_s22 }
 0x2e9   : > { %1453 = vrot.lane.b32.xlu0 %v3613_v45, %s2869_s8  ;;  %1455 = vrot.lane.b32.xlu1 %v3621_v5, %s2869_s8 }
 0x2ed   : > { %1570 = vrot.lane.b32.xlu0 %v3615_v14, %s2872_s22  ;;  %1572 = vrot.lane.b32.xlu1 %v3623_v12, %s2872_s22 }
 0x2f1   : > { %1449 = vrot.lane.b32.xlu0 %v3615_v14, %s2869_s8  ;;  %1451 = vrot.lane.b32.xlu1 %v3623_v12, %s2869_s8 }
 0x2f5   : > { %1582 = vrot.lane.b32.xlu0 %v3629_v3, %s2872_s22  ;;  %1580 = vrot.lane.b32.xlu1 %v3639_v0, %s2872_s22 }
 0x2f9   : > { %1578 = vrot.lane.b32.xlu0 %v3631_v29, %s2872_s22  ;;  %1459 = vrot.lane.b32.xlu1 %v3639_v0, %s2869_s8 }
 0x2fb   : > { %v1406_v30 = vpop.permute.xlu0 %1405  ;;  %v1527_v37 = vpop.permute.xlu1 %1526 }
 0x2fc   : > { %v1619_v18 = vadd.f32 %v1527_v37, %v1492_v38  ;;  %v1496_v8 = vadd.f32 %v1406_v30, %v3539_v44 }
 0x2fd   : > { %1457 = vrot.lane.b32.xlu0 %v3631_v29, %s2869_s8  ;;  %1584 = vrot.lane.b32.xlu1 %v3637_v35, %s2872_s22  ;;  %s3822_s8 = scalar_lea.vmem [#allocation5], %s2242_s17  ;;  %s2301_s17 = sshll.u32 %s2937_s28, 12 }
 0x2fe   : > { %v1660_v7 = vadd.f32 %v3693_v23, %v1619_v18  ;;  %s2162_s11 = sshll.u32 %s3822_s8, 4  ;;  %s3914_s20 = scalar_lea.hbm %s3970_s7, %s2301_s17  ;;  %s3916_s11 = int_to_ptr.vmem [resolvable:$true] %s2162_s11 }
 0x2ff   : > { %v1402_v33 = vpop.permute.xlu1 %1401  ;;  %v1529_v42 = vpop.permute.xlu0 %1528  ;;  %s2149_s28 = scalar_lea.sflag [#allocation4], %s3020_s16  ;;  %p2805_p8 = scmp.lt.s32.totalorder %s3916_s11, %s2803_s29 }
 0x300   : > { %v1620_v55 = vadd.f32 %v1529_v42, %v1493_v21  ;;  %v1692_v28 = vmax.f32 %v1660_v7, 0.0  ;;  %v1494_v59 = vadd.f32 %v3517_v54, %v1402_v33 }
 0x301   : > { %1586 = vrot.lane.b32.xlu0 %v3978_v13, %s2872_s22 }
 0x302   : > { %v1661_v9 = vadd.f32 %v3693_v23, %v1620_v55 }
 0x303   : > { %v1408_v63 = vpop.permute.xlu1 %1407  ;;  %v1404_v2 = vpop.permute.xlu0 %1403 }
 0x304   : > { %v1693_v48 = vmax.f32 %v1661_v9, 0.0  ;;  %v1497_v41 = vadd.f32 %v1408_v63, %v3543_v6  ;;  %v1495_v38 = vadd.f32 %v3525_v58, %v1404_v2 }
 0x306   : > { %v1724_v34 = vpack.c.bf16 %v1693_v48, %v1692_v28 }
 0x307   : > { %v1535_v27 = vpop.permute.xlu0 %1534  ;;  %v1531_v25 = vpop.permute.xlu1 %1530 }
 0x308   : > { %v1623_v26 = vadd.f32 %v1535_v27, %v1496_v8  ;;  %1767 = vrot.lane.b32.xlu1 %v1724_v34, %s2872_s22  ;;  %v1621_v44 = vadd.f32 %v1531_v25, %v1494_v59 }
 0x30a   : > { %v1664_v47 = vadd.f32 %v3693_v23, %v1623_v26  ;;  %v1662_v18 = vadd.f32 %v3693_v23, %v1621_v44 }
 0x30b   : > { %v1414_v24 = vpop.permute.xlu0 %1413  ;;  %v1537_v43 = vpop.permute.xlu1 %1536 }
 0x30c   : > { %v1624_v53 = vadd.f32 %v1537_v43, %v1497_v41  ;;  %v1696_v61 = vmax.f32 %v1664_v47, 0.0  ;;  %v1500_v42 = vadd.f32 %v1414_v24, %v3555_v50  ;;  %v1694_v13 = vmax.f32 %v1662_v18, 0.0 }
 0x30e   : > { %v1665_v49 = vadd.f32 %v3693_v23, %v1624_v53 }
 0x30f   : > { %v1410_v32 = vpop.permute.xlu0 %1409  ;;  %v1416_v17 = vpop.permute.xlu1 %1415 }
 0x310   : > { %v1697_v40 = vmax.f32 %v1665_v49, 0.0  ;;  %v1501_v54 = vadd.f32 %v1416_v17, %v3559_v10  ;;  %v1498_v50 = vadd.f32 %v3533_v39, %v1410_v32 }
 0x312   : > { %v1726_v30 = vpack.c.bf16 %v1697_v40, %v1696_v61 }
 0x313   : > { %v1412_v6 = vpop.permute.xlu1 %1411  ;;  %v1533_v37 = vpop.permute.xlu0 %1532 }
 0x314   : > { %v1622_v21 = vadd.f32 %v1533_v37, %v1495_v38  ;;  %1771 = vrot.lane.b32.xlu1 %v1726_v30, %s2872_s22  ;;  %v1499_v10 = vadd.f32 %v3541_v51, %v1412_v6 }
 0x316   : > { %v1663_v33 = vadd.f32 %v3693_v23, %v1622_v21 }
 0x317   : > { %v1543_v7 = vpop.permute.xlu0 %1542  ;;  %v1545_v55 = vpop.permute.xlu1 %1544 }
 0x318   : > { %v1695_v9 = vmax.f32 %v1663_v33, 0.0  ;;  %v1627_v63 = vadd.f32 %v1543_v7, %v1500_v42  ;;  %v1628_v58 = vadd.f32 %v1545_v55, %v1501_v54 }
 0x31a   : > { %v1668_v2 = vadd.f32 %v3693_v23, %v1627_v63  ;;  %v1669_v28 = vadd.f32 %v3693_v23, %v1628_v58  ;;  %v1725_v48 = vpack.c.bf16 %v1695_v9, %v1694_v13 }
 0x31b   : > { %v1422_v8 = vpop.permute.xlu0 %1421  ;;  %v1424_v34 = vpop.permute.xlu1 %1423 }
 0x31c   : > { %v1700_v57 = vmax.f32 %v1668_v2, 0.0  ;;  %v1701_v16 = vmax.f32 %v1669_v28, 0.0  ;;  %1769 = vrot.lane.b32.xlu0 %v1725_v48, %s2872_s22  ;;  %v1504_v61 = vadd.f32 %v1422_v8, %v3567_v62  ;;  %v1505_v39 = vadd.f32 %v1424_v34, %v3575_v20 }
 0x31e   : > { %v1728_v27 = vpack.c.bf16 %v1701_v16, %v1700_v57 }
 0x31f   : > { %v1539_v25 = vpop.permute.xlu0 %1538  ;;  %v1541_v26 = vpop.permute.xlu1 %1540 }
 0x320   : > { %v1625_v41 = vadd.f32 %v1539_v25, %v1498_v50  ;;  %v1626_v24 = vadd.f32 %v1541_v26, %v1499_v10  ;;  %1775 = vrot.lane.b32.xlu1 %v1728_v27, %s2872_s22 }
 0x322   : > { %v1666_v43 = vadd.f32 %v3693_v23, %v1625_v41  ;;  %v1667_v47 = vadd.f32 %v3693_v23, %v1626_v24 }
 0x323   : > { %v1418_v53 = vpop.permute.xlu0 %1417  ;;  %v1420_v59 = vpop.permute.xlu1 %1419 }
 0x324   : > { %v1698_v49 = vmax.f32 %v1666_v43, 0.0  ;;  %v1699_v17 = vmax.f32 %v1667_v47, 0.0  ;;  %v1502_v54 = vadd.f32 %v3549_v19, %v1418_v53  ;;  %v1503_v62 = vadd.f32 %v3557_v4, %v1420_v59 }
 0x326   : > { %v1727_v51 = vpack.c.bf16 %v1699_v17, %v1698_v49 }
 0x327   : > { %v1551_v32 = vpop.permute.xlu0 %1550  ;;  %v1553_v44 = vpop.permute.xlu1 %1552 }
 0x328   : > { %v1631_v40 = vadd.f32 %v1551_v32, %v1504_v61  ;;  %v1632_v38 = vadd.f32 %v1553_v44, %v1505_v39  ;;  %1773 = vrot.lane.b32.xlu0 %v1727_v51, %s2872_s22 }
 0x32a   : > { %v1672_v30 = vadd.f32 %v3693_v23, %v1631_v40  ;;  %v1673_v6 = vadd.f32 %v3693_v23, %v1632_v38 }
 0x32b   : > { %v1430_v37 = vpop.permute.xlu0 %1429  ;;  %v1432_v18 = vpop.permute.xlu1 %1431 }
 0x32c   : > { %v1704_v21 = vmax.f32 %v1672_v30, 0.0  ;;  %v1705_v42 = vmax.f32 %v1673_v6, 0.0  ;;  %v1508_v8 = vadd.f32 %v1430_v37, %v3583_v15  ;;  %v1509_v19 = vadd.f32 %v1432_v18, %v3591_v22 }
 0x32e   : > { %v1730_v20 = vpack.c.bf16 %v1705_v42, %v1704_v21 }
 0x32f   : > { %v1547_v33 = vpop.permute.xlu0 %1546  ;;  %v1549_v7 = vpop.permute.xlu1 %1548 }
 0x330   : > { %v1629_v55 = vadd.f32 %v1547_v33, %v1502_v54  ;;  %v1630_v13 = vadd.f32 %v1549_v7, %v1503_v62  ;;  %1779 = vrot.lane.b32.xlu1 %v1730_v20, %s2872_s22 }
 0x332   : > { %v1670_v9 = vadd.f32 %v3693_v23, %v1629_v55  ;;  %v1671_v63 = vadd.f32 %v3693_v23, %v1630_v13 }
 0x333   : > { %v1426_v58 = vpop.permute.xlu0 %1425  ;;  %v1428_v2 = vpop.permute.xlu1 %1427 }
 0x334   : > { %v1702_v28 = vmax.f32 %v1670_v9, 0.0  ;;  %v1703_v48 = vmax.f32 %v1671_v63, 0.0  ;;  %v1506_v43 = vadd.f32 %v3565_v52, %v1426_v58  ;;  %v1507_v15 = vadd.f32 %v3573_v56, %v1428_v2 }
 0x336   : > { %v1729_v4 = vpack.c.bf16 %v1703_v48, %v1702_v28 }
 0x337   : > { %v1559_v34 = vpop.permute.xlu0 %1558  ;;  %v1561_v57 = vpop.permute.xlu1 %1560 }
 0x338   : > { %v1635_v16 = vadd.f32 %v1559_v34, %v1508_v8  ;;  %v1636_v50 = vadd.f32 %v1561_v57, %v1509_v19  ;;  %1777 = vrot.lane.b32.xlu0 %v1729_v4, %s2872_s22 }
 0x33a   : > { %v1676_v10 = vadd.f32 %v3693_v23, %v1635_v16  ;;  %v1677_v27 = vadd.f32 %v3693_v23, %v1636_v50 }
 0x33b   : > { %v1438_v25 = vpop.permute.xlu0 %1437  ;;  %v1440_v26 = vpop.permute.xlu1 %1439 }
 0x33c   : > { %v1708_v41 = vmax.f32 %v1676_v10, 0.0  ;;  %v1709_v24 = vmax.f32 %v1677_v27, 0.0  ;;  %v1512_v40 = vadd.f32 %v1438_v25, %v3599_v36  ;;  %v1513_v52 = vadd.f32 %v1440_v26, %v3607_v46 }
 0x33e   : > { %v1732_v22 = vpack.c.bf16 %v1709_v24, %v1708_v41 }
 0x33f   : > { %v1555_v47 = vpop.permute.xlu0 %1554  ;;  %v1557_v53 = vpop.permute.xlu1 %1556 }
 0x340   : > { %v1633_v59 = vadd.f32 %v1555_v47, %v1506_v43  ;;  %v1634_v49 = vadd.f32 %v1557_v53, %v1507_v15  ;;  %1783 = vrot.lane.b32.xlu1 %v1732_v22, %s2872_s22 }
 0x342   : > { %v1674_v17 = vadd.f32 %v3693_v23, %v1633_v59  ;;  %v1675_v61 = vadd.f32 %v3693_v23, %v1634_v49 }
 0x343   : > { %v1434_v39 = vpop.permute.xlu0 %1433  ;;  %v1436_v51 = vpop.permute.xlu1 %1435 }
 0x344   : > { %v1706_v32 = vmax.f32 %v1674_v17, 0.0  ;;  %v1707_v44 = vmax.f32 %v1675_v61, 0.0  ;;  %v1510_v33 = vadd.f32 %v3581_v31, %v1434_v39  ;;  %v1511_v36 = vadd.f32 %v3589_v60, %v1436_v51 }
 0x346   : > { %v1731_v56 = vpack.c.bf16 %v1707_v44, %v1706_v32 }
 0x347   : > { %v1567_v38 = vpop.permute.xlu0 %1566  ;;  %v1569_v30 = vpop.permute.xlu1 %1568 }
 0x348   : > { %v1639_v6 = vadd.f32 %v1567_v38, %v1512_v40  ;;  %v1640_v37 = vadd.f32 %v1569_v30, %v1513_v52  ;;  %1781 = vrot.lane.b32.xlu0 %v1731_v56, %s2872_s22 }
 0x34a   : > { %v1680_v18 = vadd.f32 %v3693_v23, %v1639_v6  ;;  %v1681_v21 = vadd.f32 %v3693_v23, %v1640_v37 }
 0x34b   : > { %v1446_v42 = vpop.permute.xlu0 %1445  ;;  %v1448_v54 = vpop.permute.xlu1 %1447 }
 0x34c   : > { %v1712_v62 = vmax.f32 %v1680_v18, 0.0  ;;  %v1713_v20 = vmax.f32 %v1681_v21, 0.0  ;;  %v1516_v19 = vadd.f32 %v1446_v42, %v3615_v14  ;;  %v1517_v31 = vadd.f32 %v1448_v54, %v3623_v12 }
 0x34e   : > { %v1734_v46 = vpack.c.bf16 %v1713_v20, %v1712_v62 }
 0x34f   : > { %v1563_v7 = vpop.permute.xlu0 %1562  ;;  %v1565_v55 = vpop.permute.xlu1 %1564 }
 0x350   : > { %v1637_v13 = vadd.f32 %v1563_v7, %v1510_v33  ;;  %v1638_v9 = vadd.f32 %v1565_v55, %v1511_v36  ;;  %1787 = vrot.lane.b32.xlu1 %v1734_v46, %s2872_s22 }
 0x352   : > { %v1678_v63 = vadd.f32 %v3693_v23, %v1637_v13  ;;  %v1679_v58 = vadd.f32 %v3693_v23, %v1638_v9 }
 0x353   : > { %v1442_v2 = vpop.permute.xlu0 %1441  ;;  %v1444_v28 = vpop.permute.xlu1 %1443 }
 0x354   : > { %v1710_v48 = vmax.f32 %v1678_v63, 0.0  ;;  %v1711_v8 = vmax.f32 %v1679_v58, 0.0  ;;  %v1514_v24 = vadd.f32 %v3597_v11, %v1442_v2  ;;  %v1515_v14 = vadd.f32 %v3605_v1, %v1444_v28 }
 0x356   : > { %v1733_v60 = vpack.c.bf16 %v1711_v8, %v1710_v48 }
 0x357   : > { %v1575_v4 = vpop.permute.xlu0 %1574  ;;  %v1577_v34 = vpop.permute.xlu1 %1576 }
 0x358   : > { %v1643_v57 = vadd.f32 %v1575_v4, %v1516_v19  ;;  %v1644_v16 = vadd.f32 %v1577_v34, %v1517_v31  ;;  %1785 = vrot.lane.b32.xlu0 %v1733_v60, %s2872_s22 }
 0x35a   : > { %v1684_v50 = vadd.f32 %v3693_v23, %v1643_v57  ;;  %v1685_v10 = vadd.f32 %v3693_v23, %v1644_v16 }
 0x35b   : > { %v1454_v27 = vpop.permute.xlu0 %1453  ;;  %v1456_v25 = vpop.permute.xlu1 %1455 }
 0x35c   : > { %v1716_v26 = vmax.f32 %v1684_v50, 0.0  ;;  %v1717_v41 = vmax.f32 %v1685_v10, 0.0  ;;  %v1520_v40 = vadd.f32 %v1454_v27, %v3631_v29  ;;  %v1521_v18 = vadd.f32 %v1456_v25, %v3639_v0 }
 0x35e   : > { %v1736_v12 = vpack.c.bf16 %v1717_v41, %v1716_v26 }
 0x35f   : > { %v1571_v43 = vpop.permute.xlu0 %1570  ;;  %v1573_v15 = vpop.permute.xlu1 %1572 }
 0x360   : > { %v1641_v22 = vadd.f32 %v1571_v43, %v1514_v24  ;;  %v1642_v47 = vadd.f32 %v1573_v15, %v1515_v14  ;;  %1791 = vrot.lane.b32.xlu1 %v1736_v12, %s2872_s22  ;;  %v3810_v24 = vld [vmem:[%s3969_s6] ss:$0 sm:$0xff]  ;;  %v2736_v14 = vld [vmem:[%s3026_s15 + $0x10] sm:$0xff] }
 0x361   : > { %v2022_v12 = vmul.f32 0.2, %v2736_v14  ;;  %v2737_v43 = vld [vmem:[%s3026_s15] sm:$0xff] }
 0x362   : > { %v1682_v53 = vadd.f32 %v3693_v23, %v1641_v22  ;;  %v1683_v59 = vadd.f32 %v3693_v23, %v1642_v47  ;;  %v2020_v15 = vmul.f32 0.2, %v2737_v43 }
 0x363   : > { %v1450_v49 = vpop.permute.xlu0 %1449  ;;  %v1452_v17 = vpop.permute.xlu1 %1451 }
 0x364   : > { %v1714_v61 = vmax.f32 %v1682_v53, 0.0  ;;  %v1715_v39 = vmax.f32 %v1683_v59, 0.0  ;;  %v1519_v11 = vadd.f32 %v3621_v5, %v1452_v17  ;;  %v1518_v52 = vadd.f32 %v3613_v45, %v1450_v49  ;;  %v2738_v59 = vld [vmem:[%s3026_s15 + $0x18] sm:$0xff]  ;;  %v2739_v17 = vld [vmem:[%s3026_s15 + $0x8] sm:$0xff] }
 0x365   : > { %v2023_v49 = vmul.f32 0.2, %v2738_v59 }
 0x366   : > { %v1735_v51 = vpack.c.bf16 %v1715_v39, %v1714_v61  ;;  %v2021_v61 = vmul.f32 0.2, %v2739_v17  ;;  %v2748_v17 = vld [vmem:[%s3026_s15 + $0x70] sm:$0xff] }
 0x367   : > { %v1583_v32 = vpop.permute.xlu0 %1582  ;;  %v1581_v1 = vpop.permute.xlu1 %1580 }
 0x368   : > { %v1646_v44 = vadd.f32 %v1581_v1, %v1519_v11  ;;  %1789 = vrot.lane.b32.xlu0 %v1735_v51, %s2872_s22  ;;  %v1647_v30 = vadd.f32 %v1583_v32, %v1520_v40 }
 0x36a   : > { %v1687_v6 = vadd.f32 %v3693_v23, %v1646_v44  ;;  %v1688_v54 = vadd.f32 %v3693_v23, %v1647_v30 }
 0x36b   : > { %v1579_v56 = vpop.permute.xlu0 %1578  ;;  %v1460_v38 = vpop.permute.xlu1 %1459 }
 0x36c   : > { %v1645_v37 = vadd.f32 %v1579_v56, %v1518_v52  ;;  %v1719_v62 = vmax.f32 %v1687_v6, 0.0  ;;  %v1523_v45 = vadd.f32 %v3637_v35, %v1460_v38  ;;  %v1720_v55 = vmax.f32 %v1688_v54, 0.0 }
 0x36e   : > { %v1686_v21 = vadd.f32 %v3693_v23, %v1645_v37 }
 0x36f   : > { %v1458_v5 = vpop.permute.xlu0 %1457  ;;  %v1585_v42 = vpop.permute.xlu1 %1584 }
 0x370   : > { %v1718_v20 = vmax.f32 %v1686_v21, 0.0  ;;  %v1648_v33 = vadd.f32 %v1585_v42, %v1521_v18  ;;  %v1522_v36 = vadd.f32 %v3629_v3, %v1458_v5  ;;  %v2740_v18 = vld [vmem:[%s3026_s15 + $0x30] sm:$0xff]  ;;  %v2741_v42 = vld [vmem:[%s3026_s15 + $0x20] sm:$0xff] }
 0x371   : > { %v2026_v21 = vmul.f32 0.2, %v2740_v18  ;;  %v2024_v54 = vmul.f32 0.2, %v2741_v42 }
 0x372   : > { %v1737_v29 = vpack.c.bf16 %v1719_v62, %v1718_v20  ;;  %v1689_v46 = vadd.f32 %v3693_v23, %v1648_v33  ;;  %v2742_v33 = vld [vmem:[%s3026_s15 + $0x38] sm:$0xff] }
 0x373   : > { %v1587_v7 = vpop.permute.xlu0 %1586 }
 0x374   : > { %v1721_v13 = vmax.f32 %v1689_v46, 0.0  ;;  %v1649_v0 = vadd.f32 %v1587_v7, %v1522_v36  ;;  %v1650_v9 = vadd.f32 %v1587_v7, %v1523_v45  ;;  %1793 = vrot.lane.b32.xlu0 %v1737_v29, %s2872_s22  ;;  %v2027_v29 = vmul.f32 0.2, %v2742_v33  ;;  %v2743_v46 = vld [vmem:[%s3026_s15 + $0x28] sm:$0xff] }
 0x375   : > { %v2025_v7 = vmul.f32 0.2, %v2743_v46 }
 0x376   : > { %v1738_v63 = vpack.c.bf16 %v1721_v13, %v1720_v55  ;;  %v1690_v58 = vadd.f32 %v3693_v23, %v1649_v0  ;;  %v1691_v2 = vadd.f32 %v3693_v23, %v1650_v9 }
 0x378   : > { %v1722_v28 = vmax.f32 %v1690_v58, 0.0  ;;  %v1723_v48 = vmax.f32 %v1691_v2, 0.0  ;;  %1795 = vrot.lane.b32.xlu1 %v1738_v63, %s2872_s22 }
 0x37a   : > { %v1739_v35 = vpack.c.bf16 %v1723_v48, %v1722_v28  ;;  %v1768_v3 = vpop.permute.xlu1 %1767 }
 0x37b   : > { %2462 = vmatprep.mubr.msk.bf16.mxu1 %vm1028_vm2, %v1768_v3 }
 0x37c   : > { %1797 = vrot.lane.b32.xlu0 %v1739_v35, %s2872_s22  ;;  %s2798_s22 = scalar_lea.vmem %s3916_s11, 4096 }
 0x37d   : > { %p2799_p6 = scmp.ne.s32.totalorder %s3916_s11, %s2798_s22  ;;  %p2806_p10 = scmp.lt.s32.totalorder %s2804_s19, %s2798_s22 }
 0x37f   : > { %p2800_p12 = pnand %p2799_p6, %p3979_p11  ;;  %p2807_p0 = por %p2806_p10, %p2805_p8 }
 0x381   : > { %p2801_p13 = pneg %p2800_p12 }
 0x383   : > { %p2808_p2 = pnand %p2807_p0, %p2801_p13 }
 0x386   : > { %v1772_v19 = vpop.permute.xlu1 %1771 }
 0x38e   : > { %v1770_v8 = vpop.permute.xlu0 %1769 }
 0x38f   : > { %2463 = vmatmul.mubr.msk.bf16.vlgmr.msra.gmra.mrb[20].mxu1 %vm1028_vm2, %v1770_v8  ;;  %v2744_v8 = vld [vmem:[%s3026_s15 + $0x50] sm:$0xff] }
 0x390   : > { %2466 = vmatprep.mubr.msk.bf16.mxu1 %vm1028_vm2, %v1772_v19  ;;  %v2030_v19 = vmul.f32 0.2, %v2744_v8 }
 0x392   : > { %v1776_v60 = vpop.permute.xlu1 %1775 }
 0x39a   : > { %v1774_v31 = vpop.permute.xlu0 %1773 }
 0x39b   : > { %2467 = vmatmul.mubr.msk.bf16.gmra.mrb[24].mxu1 %vm1028_vm2, %v1774_v31 }
 0x39c   : > { %2470 = vmatprep.mubr.msk.bf16.mxu1 %vm1028_vm2, %v1776_v60  ;;  %v2745_v60 = vld [vmem:[%s3026_s15 + $0x40] sm:$0xff] }
 0x3a2   : > { %v1780_v4 = vpop.permute.xlu1 %1779 }
 0x3aa   : > { %v1778_v23 = vpop.permute.xlu0 %1777 }
 0x3ab   : > { %2471 = vmatmul.mubr.msk.bf16.gmra.mrb[28].mxu1 %vm1028_vm2, %v1778_v23  ;;  %v2028_v23 = vmul.f32 0.2, %v2745_v60 }
 0x3ac   : > { %2474 = vmatprep.mubr.msk.bf16.mxu1 %vm1028_vm2, %v1780_v4 }
 0x3b2   : > { %v1784_v57 = vpop.permute.xlu1 %1783 }
 0x3ba   : > { %v1782_v34 = vpop.permute.xlu0 %1781 }
 0x3bb   : > { %2475 = vmatmul.mubr.msk.bf16.gmra.mrb[32].mxu1 %vm1028_vm2, %v1782_v34 }
 0x3bc   : > { %2478 = vmatprep.mubr.msk.bf16.mxu1 %vm1028_vm2, %v1784_v57  ;;  %v2746_v57 = vld [vmem:[%s3026_s15 + $0x58] sm:$0xff] }
 0x3c2   : > { %v1788_v50 = vpop.permute.xlu1 %1787 }
 0x3ca   : > { %v1786_v16 = vpop.permute.xlu0 %1785 }
 0x3cb   : > { %2479 = vmatmul.mubr.msk.bf16.gmra.mrb[36].mxu1 %vm1028_vm2, %v1786_v16  ;;  %v2031_v16 = vmul.f32 0.2, %v2746_v57 }
 0x3cc   : > { %2482 = vmatprep.mubr.msk.bf16.mxu1 %vm1028_vm2, %v1788_v50 }
 0x3d2   : > { %v1792_v27 = vpop.permute.xlu1 %1791 }
 0x3da   : > { %v1790_v10 = vpop.permute.xlu0 %1789 }
 0x3db   : > { %2483 = vmatmul.mubr.msk.bf16.gmra.mrb[40].mxu1 %vm1028_vm2, %v1790_v10 }
 0x3dc   : > { %2486 = vmatprep.mubr.msk.bf16.mxu1 %vm1028_vm2, %v1792_v27  ;;  %v2747_v27 = vld [vmem:[%s3026_s15 + $0x48] sm:$0xff] }
 0x3e6   : > { %v1794_v25 = vpop.permute.xlu0 %1793 }
 0x3e7   : > { %2487 = vmatmul.mubr.msk.bf16.gmra.mrb[44].mxu1 %vm1028_vm2, %v1794_v25  ;;  %v2029_v25 = vmul.f32 0.2, %v2747_v27 }
 0x3ea   : > { %v1796_v26 = vpop.permute.xlu1 %1795 }
 0x3eb   : > { %2490 = vmatprep.mubr.msk.bf16.mxu1 %vm1028_vm2, %v1796_v26 }
 0x3ee   : > { %v1798_v41 = vpop.permute.xlu0 %1797 }
 0x3ef   : > { %2491 = vmatmul.mubr.msk.bf16.gmra.mrb[48].mxu1 %vm1028_vm2, %v1798_v41 }
 0x462   : > { %v2464_v22 = vpop.f32.mrb[20].mxu1 }
 0x463   : > { %v1902_v47 = vadd.f32 %v2464_v22, %v3810_v24  ;;  %v1893_v53 = vpop.f32.mrb[21].mxu1 }
 0x464   : > { %v1894_v39 = vadd.f32 %v3810_v24, %v1893_v53  ;;  %v2465_v51 = vpop.f32.mrb[22].mxu1 }
 0x465   : > { %v2054_v11 = vadd.f32 %v2022_v12, %v1902_v47  ;;  %v1905_v32 = vadd.f32 %v2465_v51, %v3810_v24  ;;  %v1896_v1 = vpop.f32.mrb[23].mxu1  ;;  %v2749_v51 = vld [vmem:[%s3026_s15 + $0x60] sm:$0xff] }
 0x466   : > { %v2052_v44 = vadd.f32 %v2020_v15, %v1894_v39  ;;  %v1897_v40 = vadd.f32 %v3810_v24, %v1896_v1 }
 0x467   : > { %v2086_v52 = vmax.f32 %v2054_v11, 0.0  ;;  %v2055_v56 = vadd.f32 %v2023_v49, %v1905_v32  ;;  %v2032_v11 = vmul.f32 0.2, %v2749_v51 }
 0x468   : > { %v2084_v38 = vmax.f32 %v2052_v44, 0.0  ;;  %v2053_v30 = vadd.f32 %v2021_v61, %v1897_v40  ;;  %v2034_v61 = vmul.f32 0.2, %v2748_v17  ;;  %v2750_v44 = vld [vmem:[%s3026_s15 + $0x78] sm:$0xff] }
 0x469   : > { %2118 = vst [vmem:[%s3822_s8 + $0x10] sm:$0xff] %v2086_v52  ;;  %v2087_v6 = vmax.f32 %v2055_v56, 0.0  ;;  %v2035_v40 = vmul.f32 0.2, %v2750_v44 }
 0x46a   : > { %2116 = vst [vmem:[%s3822_s8] sm:$0xff] %v2084_v38  ;;  %v2085_v37 = vmax.f32 %v2053_v30, 0.0  ;;  %v2751_v38 = vld [vmem:[%s3026_s15 + $0x68] sm:$0xff] }
 0x46b   : > { %2119 = vst [vmem:[%s3822_s8 + $0x18] sm:$0xff] %v2087_v6  ;;  %v2033_v30 = vmul.f32 0.2, %v2751_v38 }
 0x46c   : > { %2117 = vst [vmem:[%s3822_s8 + $0x8] sm:$0xff] %v2085_v37 }
 0x46e   : > { %v2468_v5 = vpop.f32.mrb[24].mxu1 }
 0x46f   : > { %v1918_v62 = vadd.f32 %v2468_v5, %v3810_v24  ;;  %v1909_v20 = vpop.f32.mrb[25].mxu1 }
 0x470   : > { %v1910_v45 = vadd.f32 %v3810_v24, %v1909_v20  ;;  %v2469_v36 = vpop.f32.mrb[26].mxu1 }
 0x471   : > { %v2058_v55 = vadd.f32 %v2026_v21, %v1918_v62  ;;  %v1921_v13 = vadd.f32 %v2469_v36, %v3810_v24  ;;  %v1912_v0 = vpop.f32.mrb[27].mxu1 }
 0x472   : > { %v2056_v9 = vadd.f32 %v2024_v54, %v1910_v45  ;;  %v1913_v63 = vadd.f32 %v3810_v24, %v1912_v0  ;;  %v2752_v45 = vld [vmem:[%s3026_s15 + $0x90] sm:$0xff] }
 0x473   : > { %v2090_v58 = vmax.f32 %v2058_v55, 0.0  ;;  %v2059_v2 = vadd.f32 %v2027_v29, %v1921_v13  ;;  %v2038_v36 = vmul.f32 0.2, %v2752_v45 }
 0x474   : > { %v2088_v28 = vmax.f32 %v2056_v9, 0.0  ;;  %v2057_v48 = vadd.f32 %v2025_v7, %v1913_v63  ;;  %v2753_v7 = vld [vmem:[%s3026_s15 + $0x80] sm:$0xff]  ;;  %v2754_v9 = vld [vmem:[%s3026_s15 + $0x98] sm:$0xff] }
 0x475   : > { %2122 = vst [vmem:[%s3822_s8 + $0x30] sm:$0xff] %v2090_v58  ;;  %v2091_v35 = vmax.f32 %v2059_v2, 0.0  ;;  %v2036_v55 = vmul.f32 0.2, %v2753_v7  ;;  %v2039_v63 = vmul.f32 0.2, %v2754_v9 }
 0x476   : > { %2120 = vst [vmem:[%s3822_s8 + $0x20] sm:$0xff] %v2088_v28  ;;  %v2089_v3 = vmax.f32 %v2057_v48, 0.0  ;;  %v2755_v28 = vld [vmem:[%s3026_s15 + $0x88] sm:$0xff] }
 0x477   : > { %2123 = vst [vmem:[%s3822_s8 + $0x38] sm:$0xff] %v2091_v35  ;;  %v2037_v48 = vmul.f32 0.2, %v2755_v28 }
 0x478   : > { %2121 = vst [vmem:[%s3822_s8 + $0x28] sm:$0xff] %v2089_v3 }
 0x47e   : > { %v2472_v31 = vpop.f32.mrb[28].mxu1 }
 0x47f   : > { %v1934_v4 = vadd.f32 %v2472_v31, %v3810_v24  ;;  %v1925_v34 = vpop.f32.mrb[29].mxu1 }
 0x480   : > { %v1926_v50 = vadd.f32 %v3810_v24, %v1925_v34  ;;  %v2473_v10 = vpop.f32.mrb[30].mxu1 }
 0x481   : > { %v2062_v26 = vadd.f32 %v2030_v19, %v1934_v4  ;;  %v1937_v41 = vadd.f32 %v2473_v10, %v3810_v24  ;;  %v1928_v14 = vpop.f32.mrb[31].mxu1 }
 0x482   : > { %v2060_v12 = vadd.f32 %v2028_v23, %v1926_v50  ;;  %v1929_v43 = vadd.f32 %v3810_v24, %v1928_v14  ;;  %v2756_v50 = vld [vmem:[%s3026_s15 + $0xb0] sm:$0xff] }
 0x483   : > { %v2094_v15 = vmax.f32 %v2062_v26, 0.0  ;;  %v2063_v22 = vadd.f32 %v2031_v16, %v1937_v41  ;;  %v2042_v10 = vmul.f32 0.2, %v2756_v50 }
 0x484   : > { %v2092_v47 = vmax.f32 %v2060_v12, 0.0  ;;  %v2061_v53 = vadd.f32 %v2029_v25, %v1929_v43  ;;  %v2757_v25 = vld [vmem:[%s3026_s15 + $0xa0] sm:$0xff]  ;;  %v2758_v12 = vld [vmem:[%s3026_s15 + $0xb8] sm:$0xff] }
 0x485   : > { %2126 = vst [vmem:[%s3822_s8 + $0x50] sm:$0xff] %v2094_v15  ;;  %v2095_v59 = vmax.f32 %v2063_v22, 0.0  ;;  %v2040_v26 = vmul.f32 0.2, %v2757_v25  ;;  %v2043_v43 = vmul.f32 0.2, %v2758_v12 }
 0x486   : > { %2124 = vst [vmem:[%s3822_s8 + $0x40] sm:$0xff] %v2092_v47  ;;  %v2093_v49 = vmax.f32 %v2061_v53, 0.0  ;;  %v2759_v47 = vld [vmem:[%s3026_s15 + $0xa8] sm:$0xff] }
 0x487   : > { %2127 = vst [vmem:[%s3822_s8 + $0x58] sm:$0xff] %v2095_v59  ;;  %v2041_v53 = vmul.f32 0.2, %v2759_v47 }
 0x488   : > { %2125 = vst [vmem:[%s3822_s8 + $0x48] sm:$0xff] %v2093_v49 }
 0x48e   : > { %v2476_v39 = vpop.f32.mrb[32].mxu1 }
 0x48f   : > { %v1950_v32 = vadd.f32 %v2476_v39, %v3810_v24  ;;  %v1941_v1 = vpop.f32.mrb[33].mxu1 }
 0x490   : > { %v1942_v52 = vadd.f32 %v3810_v24, %v1941_v1  ;;  %v2477_v56 = vpop.f32.mrb[34].mxu1 }
 0x491   : > { %v2066_v6 = vadd.f32 %v2034_v61, %v1950_v32  ;;  %v1953_v37 = vadd.f32 %v2477_v56, %v3810_v24  ;;  %v1944_v18 = vpop.f32.mrb[35].mxu1 }
 0x492   : > { %v2064_v21 = vadd.f32 %v2032_v11, %v1942_v52  ;;  %v1945_v5 = vadd.f32 %v3810_v24, %v1944_v18  ;;  %v2760_v52 = vld [vmem:[%s3026_s15 + $0xd0] sm:$0xff] }
 0x493   : > { %v2098_v42 = vmax.f32 %v2066_v6, 0.0  ;;  %v2067_v54 = vadd.f32 %v2035_v40, %v1953_v37  ;;  %v2046_v56 = vmul.f32 0.2, %v2760_v52 }
 0x494   : > { %v2096_v62 = vmax.f32 %v2064_v21, 0.0  ;;  %v2065_v20 = vadd.f32 %v2033_v30, %v1945_v5  ;;  %v2761_v30 = vld [vmem:[%s3026_s15 + $0xc0] sm:$0xff]  ;;  %v2762_v21 = vld [vmem:[%s3026_s15 + $0xd8] sm:$0xff] }
 0x495   : > { %2130 = vst [vmem:[%s3822_s8 + $0x70] sm:$0xff] %v2098_v42  ;;  %v2099_v33 = vmax.f32 %v2067_v54, 0.0  ;;  %v2044_v6 = vmul.f32 0.2, %v2761_v30  ;;  %v2047_v5 = vmul.f32 0.2, %v2762_v21 }
 0x496   : > { %2128 = vst [vmem:[%s3822_s8 + $0x60] sm:$0xff] %v2096_v62  ;;  %v2097_v29 = vmax.f32 %v2065_v20, 0.0  ;;  %v2763_v62 = vld [vmem:[%s3026_s15 + $0xc8] sm:$0xff] }
 0x497   : > { %2131 = vst [vmem:[%s3822_s8 + $0x78] sm:$0xff] %v2099_v33  ;;  %v2045_v20 = vmul.f32 0.2, %v2763_v62 }
 0x498   : > { %2129 = vst [vmem:[%s3822_s8 + $0x68] sm:$0xff] %v2097_v29 }
 0x49e   : > { %v2480_v46 = vpop.f32.mrb[36].mxu1 }
 0x49f   : > { %v1966_v13 = vadd.f32 %v2480_v46, %v3810_v24  ;;  %v1957_v0 = vpop.f32.mrb[37].mxu1 }
 0x4a0   : > { %v1958_v58 = vadd.f32 %v3810_v24, %v1957_v0  ;;  %v2481_v2 = vpop.f32.mrb[38].mxu1 }
 0x4a1   : > { %v2070_v35 = vadd.f32 %v2038_v36, %v1966_v13  ;;  %v1969_v3 = vadd.f32 %v2481_v2, %v3810_v24  ;;  %v1960_v8 = vpop.f32.mrb[39].mxu1 }
 0x4a2   : > { %v2068_v19 = vadd.f32 %v2036_v55, %v1958_v58  ;;  %v1961_v31 = vadd.f32 %v3810_v24, %v1960_v8 }
 0x4a3   : > { %v2102_v60 = vmax.f32 %v2070_v35, 0.0  ;;  %v2071_v23 = vadd.f32 %v2039_v63, %v1969_v3  ;;  %v2764_v63 = vld [vmem:[%s3026_s15 + $0xf0] sm:$0xff] }
 0x4a4   : > { %v2100_v4 = vmax.f32 %v2068_v19, 0.0  ;;  %v2069_v34 = vadd.f32 %v2037_v48, %v1961_v31  ;;  %v2050_v58 = vmul.f32 0.2, %v2764_v63  ;;  %v2765_v48 = vld [vmem:[%s3026_s15 + $0xe0] sm:$0xff]  ;;  %v2766_v19 = vld [vmem:[%s3026_s15 + $0xf8] sm:$0xff] }
 0x4a5   : > { %2134 = vst [vmem:[%s3822_s8 + $0x90] sm:$0xff] %v2102_v60  ;;  %v2103_v57 = vmax.f32 %v2071_v23, 0.0  ;;  %v2048_v35 = vmul.f32 0.2, %v2765_v48  ;;  %v2051_v31 = vmul.f32 0.2, %v2766_v19 }
 0x4a6   : > { %2132 = vst [vmem:[%s3822_s8 + $0x80] sm:$0xff] %v2100_v4  ;;  %v2101_v16 = vmax.f32 %v2069_v34, 0.0  ;;  %v2767_v4 = vld [vmem:[%s3026_s15 + $0xe8] sm:$0xff] }
 0x4a7   : > { %2135 = vst [vmem:[%s3822_s8 + $0x98] sm:$0xff] %v2103_v57  ;;  %v2049_v34 = vmul.f32 0.2, %v2767_v4 }
 0x4a8   : > { %2133 = vst [vmem:[%s3822_s8 + $0x88] sm:$0xff] %v2101_v16 }
 0x4ae   : > { %v2484_v27 = vpop.f32.mrb[40].mxu1 }
 0x4af   : > { %v1982_v41 = vadd.f32 %v2484_v27, %v3810_v24  ;;  %v1973_v14 = vpop.f32.mrb[41].mxu1 }
 0x4b0   : > { %v1974_v15 = vadd.f32 %v3810_v24, %v1973_v14  ;;  %v2485_v22 = vpop.f32.mrb[42].mxu1 }
 0x4b1   : > { %v2074_v59 = vadd.f32 %v2042_v10, %v1982_v41  ;;  %v1985_v49 = vadd.f32 %v2485_v22, %v3810_v24  ;;  %v1976_v17 = vpop.f32.mrb[43].mxu1 }
 0x4b2   : > { %v2072_v61 = vadd.f32 %v2040_v26, %v1974_v15  ;;  %v1977_v39 = vadd.f32 %v3810_v24, %v1976_v17 }
 0x4b3   : > { %v2106_v51 = vmax.f32 %v2074_v59, 0.0  ;;  %v2075_v11 = vadd.f32 %v2043_v43, %v1985_v49 }
 0x4b4   : > { %v2104_v32 = vmax.f32 %v2072_v61, 0.0  ;;  %v2073_v1 = vadd.f32 %v2041_v53, %v1977_v39 }
 0x4b5   : > { %2138 = vst [vmem:[%s3822_s8 + $0xb0] sm:$0xff] %v2106_v51  ;;  %v2107_v44 = vmax.f32 %v2075_v11, 0.0 }
 0x4b6   : > { %2136 = vst [vmem:[%s3822_s8 + $0xa0] sm:$0xff] %v2104_v32  ;;  %v2105_v40 = vmax.f32 %v2073_v1, 0.0 }
 0x4b7   : > { %2139 = vst [vmem:[%s3822_s8 + $0xb8] sm:$0xff] %v2107_v44 }
 0x4b8   : > { %2137 = vst [vmem:[%s3822_s8 + $0xa8] sm:$0xff] %v2105_v40 }
 0x4ba   : > { %v2488_v38 = vpop.f32.mrb[44].mxu1 }
 0x4bb   : > { %v1998_v37 = vadd.f32 %v2488_v38, %v3810_v24  ;;  %v1989_v18 = vpop.f32.mrb[45].mxu1 }
 0x4bc   : > { %v1990_v42 = vadd.f32 %v3810_v24, %v1989_v18  ;;  %v2489_v54 = vpop.f32.mrb[46].mxu1 }
 0x4bd   : > { %v2078_v33 = vadd.f32 %v2046_v56, %v1998_v37  ;;  %v2001_v29 = vadd.f32 %v2489_v54, %v3810_v24  ;;  %v1992_v45 = vpop.f32.mrb[47].mxu1 }
 0x4be   : > { %v2076_v36 = vadd.f32 %v2044_v6, %v1990_v42  ;;  %v1993_v46 = vadd.f32 %v3810_v24, %v1992_v45 }
 0x4bf   : > { %v2110_v7 = vmax.f32 %v2078_v33, 0.0  ;;  %v2079_v55 = vadd.f32 %v2047_v5, %v2001_v29 }
 0x4c0   : > { %v2108_v13 = vmax.f32 %v2076_v36, 0.0  ;;  %v2077_v0 = vadd.f32 %v2045_v20, %v1993_v46 }
 0x4c1   : > { %2142 = vst [vmem:[%s3822_s8 + $0xd0] sm:$0xff] %v2110_v7  ;;  %v2111_v9 = vmax.f32 %v2079_v55, 0.0 }
 0x4c2   : > { %2140 = vst [vmem:[%s3822_s8 + $0xc0] sm:$0xff] %v2108_v13  ;;  %v2109_v2 = vmax.f32 %v2077_v0, 0.0  ;;  %v2492_v28 = vpop.f32.mrb[48].mxu1 }
 0x4c3   : > { %2143 = vst [vmem:[%s3822_s8 + $0xd8] sm:$0xff] %v2111_v9  ;;  %v2014_v3 = vadd.f32 %v2492_v28, %v3810_v24  ;;  %v2005_v8 = vpop.f32.mrb[49].mxu1 }
 0x4c4   : > { %2141 = vst [vmem:[%s3822_s8 + $0xc8] sm:$0xff] %v2109_v2  ;;  %v2006_v60 = vadd.f32 %v3810_v24, %v2005_v8  ;;  %v2493_v23 = vpop.f32.mrb[50].mxu1 }
 0x4c5   : > { %v2082_v57 = vadd.f32 %v2050_v58, %v2014_v3  ;;  %v2017_v16 = vadd.f32 %v2493_v23, %v3810_v24  ;;  %v2008_v50 = vpop.f32.mrb[51].mxu1 }
 0x4c6   : > { %v2080_v10 = vadd.f32 %v2048_v35, %v2006_v60  ;;  %v2009_v27 = vadd.f32 %v3810_v24, %v2008_v50 }
 0x4c7   : > { %v2114_v25 = vmax.f32 %v2082_v57, 0.0  ;;  %v2083_v26 = vadd.f32 %v2051_v31, %v2017_v16 }
 0x4c8   : > { %v2112_v41 = vmax.f32 %v2080_v10, 0.0  ;;  %v2081_v14 = vadd.f32 %v2049_v34, %v2009_v27 }
 0x4c9   : > { %2146 = vst [vmem:[%s3822_s8 + $0xf0] sm:$0xff] %v2114_v25  ;;  %v2115_v12 = vmax.f32 %v2083_v26, 0.0 }
 0x4ca   : > { %2144 = vst [vmem:[%s3822_s8 + $0xe0] sm:$0xff] %v2112_v41  ;;  %v2113_v24 = vmax.f32 %v2081_v14, 0.0 }
 0x4cb   : > { %2147 = vst [vmem:[%s3822_s8 + $0xf8] sm:$0xff] %v2115_v12 }
 0x4cc   : > { %2145 = vst [vmem:[%s3822_s8 + $0xe8] sm:$0xff] %v2113_v24 }
 0x4cd   : > { %2811 = shalt.err (!%p2808_p2)
}
 0x4ce   : > { %s2812_s21 = scalar_lea.hbm %s3914_s20, 4096  ;;  %s2816_s8 = scalar_lea.hbm %s3970_s7, 8192 }
 0x4cf   : > { %p2813_p4 = scmp.ne.s32.totalorder %s3914_s20, %s2812_s21  ;;  %p2817_p9 = scmp.lt.u32.totalorder %s3914_s20, %s3970_s7 }
 0x4d0   : > { %p2818_p1 = scmp.lt.u32.totalorder %s2816_s8, %s2812_s21  ;;  %p2820_p6 = scmp.lt.u32.totalorder %s2812_s21, %s3914_s20 }
 0x4d1   : > { %p2814_p5 = pnand %p2813_p4, %p3979_p11 }
 0x4d2   : > { %p2819_p3 = por %p2818_p1, %p2817_p9 }
 0x4d3   : > { %p2815_p7 = pneg %p2814_p5 }
 0x4d4   : > { %p2821_p12 = por %p2820_p6, %p2819_p3 }
 0x4d6   : > { %p2822_p13 = pnand %p2821_p12, %p2815_p7 }
 0x4d8   : > { %2825 = shalt.err (!%p2822_p13)
}
 0x4d9   : > { %s2874_s18 = smov 128   ;;  %s2875_s22 = smov 8  }
 0x4da   : > { %2508 = dma.vmem_to_hbm [thread:$0]  (%p3979_p11), %s3916_s11, 4096, %s3914_s20, %s2149_s28, %s2874_s18, %s2874_s18, %s2875_s22  }
 0x4db PF: > { %s2177_s23 = sand.u32 1, %s2852_s24   ;;  %p3980_p8 = scmp.ne.s32.totalorder %s3976_s14, 0 }
 0x4dc   : > { %p3981_p10 = scmp.ge.s32.totalorder %s2864_s27, 2  ;;  %s2178_s29 = scalar_lea.sflag [#allocation4], %s2177_s23 }
 0x4de   : > { %p2515_p0 = pnand %p3981_p10, %p3980_p8 }
 0x4e0   : > { %2847 = dma.done.wait (!%p2515_p0), %s2178_s29, 4096  }
 0x4e1   : > { %2849 = vsyncadd (!%p2515_p0), %s2178_s29, 4294963200  ;;  %p20_p2 = scmp.ge.s32.totalorder %s2941_s30, 4   ;;  %s3982_s24 = smov %s2856_s25 }
 0x4e2   : > { %s3983_s25 = smov %s2860_s26  ;;  %s3984_s26 = smov %s2953_s10 }
 0x4e3   : > { %s3985_s27 = smov %s2941_s30  ;;  %22 = sbr.rel (!%p20_p2) target bundleno = 5 (0x5), region = 93 }
 0x4ea   :  { %2183 = vsyncpa [#allocation3], 1 }
 0x4eb   :  { %2185 = vsyncpa [#allocation3 + $0x1], 1 }
 0x4ec   :  { %2186 = vsyncpa [#allocation4], 1 }
 0x4ed   :  { %2188 = vsyncpa [#allocation4 + $0x1], 1 }

</bundles_post_ra>
